<compile_context>
chip_gen: v6e
topology: v6e:2x2x1
jax: 0.10.0
libtpu: 0.0.40
codegen_flags: <defaults>
</compile_context>

<pallas_src>
import numpy as np
import jax
import jax.numpy as jnp
from jax import lax
from jax.experimental import pallas as pl
from jax.experimental.pallas import tpu as pltpu

# ---- small synthetic CLIP text-encoder config ----
VOCAB = 128           # lane-aligned for the in-kernel one-hot gather
MAX_LEN = 8           # real CLIP max_length = 77; small here
HIDDEN = 32
HEADS = 4
HEAD_DIM = HIDDEN // HEADS
MLP = 4 * HIDDEN
LAYERS = 2
BATCH = 2
DROPOUT_PROB = 0.1
PAD_ID, BOS_ID, EOS_ID = 0, 1, 2
LN_EPS = 1e-5


# ----------------------------- Pallas kernel -----------------------------

def _layer_norm(x, w, b):
    mu = jnp.mean(x, axis=-1, keepdims=True)
    var = jnp.mean(jnp.square(x - mu), axis=-1, keepdims=True)
    return (x - mu) * lax.rsqrt(var + LN_EPS) * w + b


def clip_encoder_kernel(tok_ref, emb_ref, pos_ref,
                        ln1w_ref, ln1b_ref,
                        qkvw_ref, qkvb_ref, ow_ref, ob_ref,
                        ln2w_ref, ln2b_ref,
                        f1w_ref, f1b_ref, f2w_ref, f2b_ref,
                        flnw_ref, flnb_ref,
                        out_ref):
    """Fused CLIP text encoder for one batch element: embed, L pre-LN layers, final LN."""
    _, S, D = out_ref.shape
    V = emb_ref.shape[0]
    L = qkvw_ref.shape[0]
    H, Dh = HEADS, HEAD_DIM

    # ---- token embedding: one-hot MXU gather (bf16 operands, f32 accumulate) + pos ----
    # TODO(synk): at real CLIP vocab (49408x768) keep tok_emb in HBM (memory_space=pl.ANY)
    # and DMA-gather rows via scalar-prefetched ids instead of the O(S*V) one-hot matmul.
    ids = tok_ref[...].reshape(S, 1)
    onehot = (lax.broadcasted_iota(jnp.int32, (S, V), 1) == ids).astype(jnp.bfloat16)
    x = jnp.dot(onehot, emb_ref[...], preferred_element_type=jnp.float32)      # (S, D) f32
    x = x + pos_ref[...]

    # ---- causal mask built once; PAD positions intentionally unmasked (matches spec:
    #      transformer(input_ids=tokens) with no attention_mask) ----
    row = lax.broadcasted_iota(jnp.int32, (S, S), 0)
    col = lax.broadcasted_iota(jnp.int32, (S, S), 1)
    causal = jnp.where(col > row, jnp.float32(-1e9), jnp.float32(0.0))[None]   # (1, S, S)

    for l in range(L):                                    # static unroll, L == 2 (toy)
        # ---- pre-LN causal self-attention: fused QKV matmul + head-batched einsums ----
        h = _layer_norm(x, ln1w_ref[l], ln1b_ref[l]).astype(jnp.bfloat16)
        # single (S, D) x (D, 3D) matmul; 1/sqrt(Dh) pre-folded into the q columns/bias
        qkv = jnp.dot(h, qkvw_ref[l], preferred_element_type=jnp.float32) + qkvb_ref[l]
        # regroup lanes -> (3H, S, Dh) via static lane slices + leading-axis stack
        qkv_g = jnp.stack([qkv[:, g * Dh:(g + 1) * Dh] for g in range(3 * H)], axis=0)
        q = qkv_g[:H].astype(jnp.bfloat16)                # (H, S, Dh)
        k = qkv_g[H:2 * H].astype(jnp.bfloat16)
        v = qkv_g[2 * H:].astype(jnp.bfloat16)
        s = jnp.einsum('hqd,hkd->hqk', q, k,
                       preferred_element_type=jnp.float32) + causal            # (H, S, S)
        # one softmax (max / exp / sum) across all heads; approx reciprocal on the EUP
        # (probabilities won't sum to exactly 1 -> tiny drift vs a PyTorch reference).
        s = s - jnp.max(s, axis=-1, keepdims=True)
        p = jnp.exp(s)
        p = p * pl.reciprocal(jnp.sum(p, axis=-1, keepdims=True), approx=True)
        ctx = jnp.einsum('hqk,hkd->hqd', p.astype(jnp.bfloat16), v,
                         preferred_element_type=jnp.float32)                   # (H, S, Dh)
        # fused output projection: contraction over (head, dh) jointly, K = H*Dh
        ctx2 = jnp.concatenate([ctx[hd] for hd in range(H)], axis=-1)          # (S, H*Dh)
        attn = jnp.dot(ctx2.astype(jnp.bfloat16), ow_ref[l],
                       preferred_element_type=jnp.float32)                     # (S, D)
        x = x + attn + ob_ref[l]

        # ---- pre-LN quick-GELU MLP (as in CLIP) ----
        h2 = _layer_norm(x, ln2w_ref[l], ln2b_ref[l]).astype(jnp.bfloat16)
        m = jnp.dot(h2, f1w_ref[l], preferred_element_type=jnp.float32) + f1b_ref[l]
        m = m * jax.nn.sigmoid(1.702 * m)
        x = x + jnp.dot(m.astype(jnp.bfloat16), f2w_ref[l],
                        preferred_element_type=jnp.float32) + f2b_ref[l]

    x = _layer_norm(x, flnw_ref[...], flnb_ref[...])
    # TODO(synk): at real hidden sizes (D multiple of 128) write a lane-dense (B*S, D)
    # slab instead; (1, S, D) blocks are kept here because D=32 < 128 at toy scale.
    out_ref[...] = x.reshape(1, S, D)


# ----------------------------- wrapper -----------------------------

@jax.jit
def clip_text_encode(tokens, kp):
    """tokens: [B, S] int32 -> last_hidden_state [B, S, D] float32."""
    B, S = tokens.shape
    D = kp["pos_emb"].shape[1]
    toks3 = tokens.astype(jnp.int32).reshape(B, S, 1)

    weights = (kp["tok_emb"], kp["pos_emb"],
               kp["ln1_w"], kp["ln1_b"],
               kp["qkv_w"], kp["qkv_b"], kp["o_w"], kp["o_b"],
               kp["ln2_w"], kp["ln2_b"],
               kp["fc1_w"], kp["fc1_b"], kp["fc2_w"], kp["fc2_b"],
               kp["final_ln_w"], kp["final_ln_b"])

    def whole(a):          # whole-array, VMEM-resident, same block for every grid step
        nd = a.ndim
        return pl.BlockSpec(a.shape, lambda b, _nd=nd: (0,) * _nd)

    in_specs = [pl.BlockSpec((1, S, 1), lambda b: (b, 0, 0))] + [whole(w) for w in weights]
    out_spec = pl.BlockSpec((1, S, D), lambda b: (b, 0, 0))

    flops = int(B * (2 * S * VOCAB * D
                     + LAYERS * (2 * S * D * 3 * D            # fused QKV
                                 + 4 * HEADS * S * S * HEAD_DIM  # scores + context
                                 + 2 * S * D * D              # output projection
                                 + 4 * S * D * MLP)))         # fc1 + fc2
    transcendentals = int(B * LAYERS * (HEADS * S * S + S * MLP) + B * (2 * LAYERS + 1) * S)
    bytes_accessed = int(sum(a.size * a.dtype.itemsize for a in (toks3,) + weights)
                         + B * S * D * 4)

    return pl.pallas_call(
        clip_encoder_kernel,
        grid=(B,),
        out_shape=jax.ShapeDtypeStruct((B, S, D), jnp.float32),
        in_specs=in_specs,
        out_specs=out_spec,
        compiler_params=pltpu.CompilerParams(
            dimension_semantics=("parallel",),          # batch across TCs on v7x
            vmem_limit_bytes=32 * 1024 * 1024),
        cost_estimate=pl.CostEstimate(flops=flops,
                                      transcendentals=transcendentals,
                                      bytes_accessed=bytes_accessed),
    )(toks3, *weights)


# ----------------------------- parameters -----------------------------

def init_params(key):
    """Synthetic frozen CLIP text-encoder weights in a 'logical' per-head layout."""
    def dense(k, din, dout):
        return 0.02 * jax.random.normal(k, (din, dout), jnp.float32)

    def per_head_in(w):   # (D, D) -> (H, D, Dh): split output columns per head
        return jnp.transpose(w.reshape(HIDDEN, HEADS, HEAD_DIM), (1, 0, 2))

    def per_head_out(w):  # (D, D) -> (H, Dh, D): split input rows per head
        return w.reshape(HEADS, HEAD_DIM, HIDDEN)

    k_emb, k_pos, *k_layers = jax.random.split(key, 2 + LAYERS)
    qw, kw, vw, ow, f1w, f2w = [], [], [], [], [], []
    for l in range(LAYERS):
        lk = jax.random.split(k_layers[l], 6)
        qw.append(per_head_in(dense(lk[0], HIDDEN, HIDDEN)))
        kw.append(per_head_in(dense(lk[1], HIDDEN, HIDDEN)))
        vw.append(per_head_in(dense(lk[2], HIDDEN, HIDDEN)))
        ow.append(per_head_out(dense(lk[3], HIDDEN, HIDDEN)))
        f1w.append(dense(lk[4], HIDDEN, MLP))
        f2w.append(dense(lk[5], MLP, HIDDEN))

    zeros_head = jnp.zeros((LAYERS, HEADS, 1, HEAD_DIM), jnp.float32)
    zeros_d = jnp.zeros((LAYERS, 1, HIDDEN), jnp.float32)
    ones_d = jnp.ones((LAYERS, 1, HIDDEN), jnp.float32)
    return {
        "tok_emb": 0.02 * jax.random.normal(k_emb, (VOCAB, HIDDEN), jnp.float32),
        "pos_emb": 0.02 * jax.random.normal(k_pos, (MAX_LEN, HIDDEN), jnp.float32),
        "ln1_w": ones_d, "ln1_b": zeros_d,
        "q_w": jnp.stack(qw), "q_b": zeros_head,
        "k_w": jnp.stack(kw), "k_b": zeros_head,
        "v_w": jnp.stack(vw), "v_b": zeros_head,
        "o_w": jnp.stack(ow), "o_b": zeros_d,
        "ln2_w": ones_d, "ln2_b": zeros_d,
        "fc1_w": jnp.stack(f1w), "fc1_b": jnp.zeros((LAYERS, 1, MLP), jnp.float32),
        "fc2_w": jnp.stack(f2w), "fc2_b": zeros_d,
        "final_ln_w": jnp.ones((1, HIDDEN), jnp.float32),
        "final_ln_b": jnp.zeros((1, HIDDEN), jnp.float32),
    }


def prep_params(p):
    """One-time frozen-weight prep: fold 1/sqrt(Dh) into q, fuse QKV columns (q|k|v,
    head-major), flatten the output projection to (H*Dh, D), cast MXU operands to bf16."""
    scale = float(HEAD_DIM) ** -0.5
    bf = lambda a: a.astype(jnp.bfloat16)

    def cols(w):  # (L, H, D, Dh) -> (L, D, H*Dh), column index = h*Dh + dh
        return jnp.transpose(w, (0, 2, 1, 3)).reshape(LAYERS, HIDDEN, HEADS * HEAD_DIM)

    qkv_w = jnp.concatenate([cols(p["q_w"] * scale), cols(p["k_w"]), cols(p["v_w"])], axis=-1)
    qkv_b = jnp.concatenate([(p["q_b"] * scale).reshape(LAYERS, 1, HEADS * HEAD_DIM),
                             p["k_b"].reshape(LAYERS, 1, HEADS * HEAD_DIM),
                             p["v_b"].reshape(LAYERS, 1, HEADS * HEAD_DIM)], axis=-1)
    o_w2 = p["o_w"].reshape(LAYERS, HEADS * HEAD_DIM, HIDDEN)   # rows head-major

    return {
        "tok_emb": bf(p["tok_emb"]), "pos_emb": p["pos_emb"],
        "ln1_w": p["ln1_w"], "ln1_b": p["ln1_b"],
        "qkv_w": bf(qkv_w), "qkv_b": qkv_b,
        "o_w": bf(o_w2), "o_b": p["o_b"],
        "ln2_w": p["ln2_w"], "ln2_b": p["ln2_b"],
        "fc1_w": bf(p["fc1_w"]), "fc1_b": p["fc1_b"],
        "fc2_w": bf(p["fc2_w"]), "fc2_b": p["fc2_b"],
        "final_ln_w": p["final_ln_w"], "final_ln_b": p["final_ln_b"],
    }


# ----------------------------- TextEmbedder -----------------------------

class TextEmbedder:
    """JAX/Pallas equivalent of S2L TextEmbedder, operating on pre-tokenized ids.

    # TODO(synk): CLIPTokenizer (string -> ids) and HF checkpoint loading have no Pallas
    # equivalent; inputs are token ids and the "empty prompt" replacement used for CFG
    # dropout is [BOS, EOS, PAD, ...].
    """

    def __init__(self, kernel_params, dropout_prob=0.1, seed=0):
        self.params = kernel_params
        self.dropout_prob = dropout_prob
        self._rng = np.random.default_rng(seed)   # seeded -> reproducible CFG dropout

    def token_drop(self, tokens, force_drop_ids=None):
        tokens = np.asarray(tokens)
        if force_drop_ids is None:
            drop_ids = self._rng.uniform(0, 1, tokens.shape[0]) < self.dropout_prob
        else:
            drop_ids = np.asarray(force_drop_ids) == 1
        empty = np.full((tokens.shape[1],), PAD_ID, np.int32)
        empty[0], empty[1] = BOS_ID, EOS_ID
        return np.where(drop_ids[:, None], empty[None, :], tokens).astype(np.int32)

    def __call__(self, tokens, train, force_drop_ids=None):
        use_dropout = self.dropout_prob > 0
        if (train and use_dropout) or (force_drop_ids is not None):
            tokens = self.token_drop(tokens, force_drop_ids)
        return clip_text_encode(jnp.asarray(tokens, jnp.int32), self.params)


# ----------------------------- main -----------------------------

if __name__ == "__main__":
    root = jax.random.PRNGKey(0)
    pkey, tkey = jax.random.split(root)
    params = init_params(pkey)
    kparams = prep_params(params)

    # deterministic "tokenized prompts": [B, S] int32
    tokens = jax.random.randint(tkey, (BATCH, MAX_LEN), 0, VOCAB, dtype=jnp.int32)
    # deterministic CFG dropout pattern (second prompt dropped)
    force_drop_ids = np.array([0, 1], dtype=np.int32)

    embedder = TextEmbedder(kparams, dropout_prob=DROPOUT_PROB)
    z = embedder(tokens, train=True, force_drop_ids=force_drop_ids)
    z = jax.block_until_ready(z)

    assert z.shape == (BATCH, MAX_LEN, HIDDEN), z.shape
    assert z.dtype == jnp.float32
    assert bool(jnp.all(jnp.isfinite(z)))
    print("KERNEL_OK")
</pallas_src>

<mosaic_0001>
module attributes {stable_mosaic.version = 11 : i64} {
  func.func @clip_encoder_kernel(%arg0: i32, %arg1: memref<1x8x1xi32, #tpu.memory_space<vmem>>, %arg2: memref<128x32xbf16, #tpu.memory_space<vmem>>, %arg3: memref<8x32xf32, #tpu.memory_space<vmem>>, %arg4: memref<2x1x32xf32, #tpu.memory_space<vmem>>, %arg5: memref<2x1x32xf32, #tpu.memory_space<vmem>>, %arg6: memref<2x32x96xbf16, #tpu.memory_space<vmem>>, %arg7: memref<2x1x96xf32, #tpu.memory_space<vmem>>, %arg8: memref<2x32x32xbf16, #tpu.memory_space<vmem>>, %arg9: memref<2x1x32xf32, #tpu.memory_space<vmem>>, %arg10: memref<2x1x32xf32, #tpu.memory_space<vmem>>, %arg11: memref<2x1x32xf32, #tpu.memory_space<vmem>>, %arg12: memref<2x32x128xbf16, #tpu.memory_space<vmem>>, %arg13: memref<2x1x128xf32, #tpu.memory_space<vmem>>, %arg14: memref<2x128x32xbf16, #tpu.memory_space<vmem>>, %arg15: memref<2x1x32xf32, #tpu.memory_space<vmem>>, %arg16: memref<1x32xf32, #tpu.memory_space<vmem>>, %arg17: memref<1x32xf32, #tpu.memory_space<vmem>>, %arg18: memref<1x8x32xf32, #tpu.memory_space<vmem>>) attributes {dimension_semantics = [#tpu.dimension_semantics<parallel>], iteration_bounds = array<i64: 2>, scalar_prefetch = 0 : i64, scratch_operands = 0 : i64, tpu.core_type = #tpu.core_type<tc>, window_params = [{transform_indices = @transform_0, window_bounds = array<i64: 1, 8, 1>}, {pipeline_mode = #tpu.pipeline_mode<synchronous>, transform_indices = @transform_1, window_bounds = array<i64: 128, 32>}, {pipeline_mode = #tpu.pipeline_mode<synchronous>, transform_indices = @transform_2, window_bounds = array<i64: 8, 32>}, {pipeline_mode = #tpu.pipeline_mode<synchronous>, transform_indices = @transform_3, window_bounds = array<i64: 2, 1, 32>}, {pipeline_mode = #tpu.pipeline_mode<synchronous>, transform_indices = @transform_4, window_bounds = array<i64: 2, 1, 32>}, {pipeline_mode = #tpu.pipeline_mode<synchronous>, transform_indices = @transform_5, window_bounds = array<i64: 2, 32, 96>}, {pipeline_mode = #tpu.pipeline_mode<synchronous>, transform_indices = @transform_6, window_bounds = array<i64: 2, 1, 96>}, {pipeline_mode = #tpu.pipeline_mode<synchronous>, transform_indices = @transform_7, window_bounds = array<i64: 2, 32, 32>}, {pipeline_mode = #tpu.pipeline_mode<synchronous>, transform_indices = @transform_8, window_bounds = array<i64: 2, 1, 32>}, {pipeline_mode = #tpu.pipeline_mode<synchronous>, transform_indices = @transform_9, window_bounds = array<i64: 2, 1, 32>}, {pipeline_mode = #tpu.pipeline_mode<synchronous>, transform_indices = @transform_10, window_bounds = array<i64: 2, 1, 32>}, {pipeline_mode = #tpu.pipeline_mode<synchronous>, transform_indices = @transform_11, window_bounds = array<i64: 2, 32, 128>}, {pipeline_mode = #tpu.pipeline_mode<synchronous>, transform_indices = @transform_12, window_bounds = array<i64: 2, 1, 128>}, {pipeline_mode = #tpu.pipeline_mode<synchronous>, transform_indices = @transform_13, window_bounds = array<i64: 2, 128, 32>}, {pipeline_mode = #tpu.pipeline_mode<synchronous>, transform_indices = @transform_14, window_bounds = array<i64: 2, 1, 32>}, {pipeline_mode = #tpu.pipeline_mode<synchronous>, transform_indices = @transform_15, window_bounds = array<i64: 1, 32>}, {pipeline_mode = #tpu.pipeline_mode<synchronous>, transform_indices = @transform_16, window_bounds = array<i64: 1, 32>}, {transform_indices = @transform_17, window_bounds = array<i64: 1, 8, 32>}]} {
    %c0 = arith.constant 0 : index
    %c0_0 = arith.constant 0 : index
    %c0_1 = arith.constant 0 : index
    %0 = vector.load %arg1[%c0, %c0_0, %c0_1] : memref<1x8x1xi32, #tpu.memory_space<vmem>>, vector<1x8x1xi32>
    %1 = vector.shape_cast %0 : vector<1x8x1xi32> to vector<8x1xi32>
    %2 = tpu.iota {dimensions = array<i32: 1>} : vector<8x128xi32>
    %3 = vector.broadcast %1 : vector<8x1xi32> to vector<8x128xi32>
    %4 = arith.cmpi eq, %2, %3 : vector<8x128xi32>
    %5 = arith.extui %4 : vector<8x128xi1> to vector<8x128xi32>
    %6 = arith.sitofp %5 : vector<8x128xi32> to vector<8x128xf32>
    %7 = arith.truncf %6 : vector<8x128xf32> to vector<8x128xbf16>
    %c0_2 = arith.constant 0 : index
    %c0_3 = arith.constant 0 : index
    %8 = vector.load %arg2[%c0_2, %c0_3] : memref<128x32xbf16, #tpu.memory_space<vmem>>, vector<128x32xbf16>
    %cst = arith.constant dense<0.000000e+00> : vector<8x32xf32>
    %9 = tpu.matmul %7, %8, %cst {dimension_numbers = #tpu.dot_dimension_numbers<[1], [0], [0], [1], [0, 0, 1, 1], [], []>} : vector<8x128xbf16>, vector<128x32xbf16>, vector<8x32xf32> -> vector<8x32xf32>
    %c0_4 = arith.constant 0 : index
    %c0_5 = arith.constant 0 : index
    %10 = vector.load %arg3[%c0_4, %c0_5] : memref<8x32xf32, #tpu.memory_space<vmem>>, vector<8x32xf32>
    %11 = arith.addf %9, %10 : vector<8x32xf32>
    %12 = tpu.iota {dimensions = array<i32: 0>} : vector<8x8xi32>
    %13 = tpu.iota {dimensions = array<i32: 1>} : vector<8x8xi32>
    %14 = arith.cmpi sgt, %13, %12 : vector<8x8xi32>
    %cst_6 = arith.constant -1.000000e+09 : f32
    %cst_7 = arith.constant 0.000000e+00 : f32
    %15 = vector.broadcast %cst_6 : f32 to vector<8x8xf32>
    %16 = vector.broadcast %cst_7 : f32 to vector<8x8xf32>
    %17 = arith.select %14, %15, %16 : vector<8x8xi1>, vector<8x8xf32>
    %18 = vector.shape_cast %17 : vector<8x8xf32> to vector<1x8x8xf32>
    %c0_8 = arith.constant 0 : index
    %c0_9 = arith.constant 0 : index
    %c0_10 = arith.constant 0 : index
    %19 = vector.load %arg4[%c0_8, %c0_9, %c0_10] : memref<2x1x32xf32, #tpu.memory_space<vmem>>, vector<1x1x32xf32>
    %20 = vector.shape_cast %19 : vector<1x1x32xf32> to vector<1x32xf32>
    %c0_11 = arith.constant 0 : index
    %c0_12 = arith.constant 0 : index
    %c0_13 = arith.constant 0 : index
    %21 = vector.load %arg5[%c0_11, %c0_12, %c0_13] : memref<2x1x32xf32, #tpu.memory_space<vmem>>, vector<1x1x32xf32>
    %22 = vector.shape_cast %21 : vector<1x1x32xf32> to vector<1x32xf32>
    %cst_14 = arith.constant dense<0.000000e+00> : vector<8xf32>
    %23 = vector.multi_reduction <add>, %11, %cst_14 [1] : vector<8x32xf32> to vector<8xf32>
    %24 = vector.shape_cast %23 : vector<8xf32> to vector<8x1xf32>
    %cst_15 = arith.constant 3.200000e+01 : f32
    %25 = vector.broadcast %cst_15 : f32 to vector<8x1xf32>
    %26 = arith.divf %24, %25 : vector<8x1xf32>
    %27 = vector.broadcast %26 : vector<8x1xf32> to vector<8x32xf32>
    %28 = arith.subf %11, %27 : vector<8x32xf32>
    %29 = arith.mulf %28, %28 : vector<8x32xf32>
    %cst_16 = arith.constant dense<0.000000e+00> : vector<8xf32>
    %30 = vector.multi_reduction <add>, %29, %cst_16 [1] : vector<8x32xf32> to vector<8xf32>
    %31 = vector.shape_cast %30 : vector<8xf32> to vector<8x1xf32>
    %cst_17 = arith.constant 3.200000e+01 : f32
    %32 = vector.broadcast %cst_17 : f32 to vector<8x1xf32>
    %33 = arith.divf %31, %32 : vector<8x1xf32>
    %34 = vector.broadcast %26 : vector<8x1xf32> to vector<8x32xf32>
    %35 = arith.subf %11, %34 : vector<8x32xf32>
    %cst_18 = arith.constant 9.99999974E-6 : f32
    %36 = vector.broadcast %cst_18 : f32 to vector<8x1xf32>
    %37 = arith.addf %33, %36 : vector<8x1xf32>
    %38 = math.rsqrt %37 : vector<8x1xf32>
    %39 = vector.broadcast %38 : vector<8x1xf32> to vector<8x32xf32>
    %40 = arith.mulf %35, %39 : vector<8x32xf32>
    %41 = vector.broadcast %20 : vector<1x32xf32> to vector<8x32xf32>
    %42 = arith.mulf %40, %41 : vector<8x32xf32>
    %43 = vector.broadcast %22 : vector<1x32xf32> to vector<8x32xf32>
    %44 = arith.addf %42, %43 : vector<8x32xf32>
    %45 = arith.truncf %44 : vector<8x32xf32> to vector<8x32xbf16>
    %c0_19 = arith.constant 0 : index
    %c0_20 = arith.constant 0 : index
    %c0_21 = arith.constant 0 : index
    %46 = vector.load %arg6[%c0_19, %c0_20, %c0_21] : memref<2x32x96xbf16, #tpu.memory_space<vmem>>, vector<1x32x96xbf16>
    %47 = vector.shape_cast %46 : vector<1x32x96xbf16> to vector<32x96xbf16>
    %cst_22 = arith.constant dense<0.000000e+00> : vector<8x96xf32>
    %48 = tpu.matmul %45, %47, %cst_22 {dimension_numbers = #tpu.dot_dimension_numbers<[1], [0], [0], [1], [0, 0, 1, 1], [], []>} : vector<8x32xbf16>, vector<32x96xbf16>, vector<8x96xf32> -> vector<8x96xf32>
    %c0_23 = arith.constant 0 : index
    %c0_24 = arith.constant 0 : index
    %c0_25 = arith.constant 0 : index
    %49 = vector.load %arg7[%c0_23, %c0_24, %c0_25] : memref<2x1x96xf32, #tpu.memory_space<vmem>>, vector<1x1x96xf32>
    %50 = vector.shape_cast %49 : vector<1x1x96xf32> to vector<1x96xf32>
    %51 = vector.broadcast %50 : vector<1x96xf32> to vector<8x96xf32>
    %52 = arith.addf %48, %51 : vector<8x96xf32>
    %53 = vector.extract_strided_slice %52 {offsets = [0, 0], sizes = [8, 8], strides = [1, 1]} : vector<8x96xf32> to vector<8x8xf32>
    %54 = vector.extract_strided_slice %52 {offsets = [0, 8], sizes = [8, 8], strides = [1, 1]} : vector<8x96xf32> to vector<8x8xf32>
    %55 = vector.extract_strided_slice %52 {offsets = [0, 16], sizes = [8, 8], strides = [1, 1]} : vector<8x96xf32> to vector<8x8xf32>
    %56 = vector.extract_strided_slice %52 {offsets = [0, 24], sizes = [8, 8], strides = [1, 1]} : vector<8x96xf32> to vector<8x8xf32>
    %57 = vector.extract_strided_slice %52 {offsets = [0, 32], sizes = [8, 8], strides = [1, 1]} : vector<8x96xf32> to vector<8x8xf32>
    %58 = vector.extract_strided_slice %52 {offsets = [0, 40], sizes = [8, 8], strides = [1, 1]} : vector<8x96xf32> to vector<8x8xf32>
    %59 = vector.extract_strided_slice %52 {offsets = [0, 48], sizes = [8, 8], strides = [1, 1]} : vector<8x96xf32> to vector<8x8xf32>
    %60 = vector.extract_strided_slice %52 {offsets = [0, 56], sizes = [8, 8], strides = [1, 1]} : vector<8x96xf32> to vector<8x8xf32>
    %61 = vector.extract_strided_slice %52 {offsets = [0, 64], sizes = [8, 8], strides = [1, 1]} : vector<8x96xf32> to vector<8x8xf32>
    %62 = vector.extract_strided_slice %52 {offsets = [0, 72], sizes = [8, 8], strides = [1, 1]} : vector<8x96xf32> to vector<8x8xf32>
    %63 = vector.extract_strided_slice %52 {offsets = [0, 80], sizes = [8, 8], strides = [1, 1]} : vector<8x96xf32> to vector<8x8xf32>
    %64 = vector.extract_strided_slice %52 {offsets = [0, 88], sizes = [8, 8], strides = [1, 1]} : vector<8x96xf32> to vector<8x8xf32>
    %65 = vector.shape_cast %53 : vector<8x8xf32> to vector<1x8x8xf32>
    %66 = vector.shape_cast %54 : vector<8x8xf32> to vector<1x8x8xf32>
    %67 = vector.shape_cast %55 : vector<8x8xf32> to vector<1x8x8xf32>
    %68 = vector.shape_cast %56 : vector<8x8xf32> to vector<1x8x8xf32>
    %69 = vector.shape_cast %57 : vector<8x8xf32> to vector<1x8x8xf32>
    %70 = vector.shape_cast %58 : vector<8x8xf32> to vector<1x8x8xf32>
    %71 = vector.shape_cast %59 : vector<8x8xf32> to vector<1x8x8xf32>
    %72 = vector.shape_cast %60 : vector<8x8xf32> to vector<1x8x8xf32>
    %73 = vector.shape_cast %61 : vector<8x8xf32> to vector<1x8x8xf32>
    %74 = vector.shape_cast %62 : vector<8x8xf32> to vector<1x8x8xf32>
    %75 = vector.shape_cast %63 : vector<8x8xf32> to vector<1x8x8xf32>
    %76 = vector.shape_cast %64 : vector<8x8xf32> to vector<1x8x8xf32>
    %77 = tpu.concatenate %65, %66, %67, %68, %69, %70, %71, %72, %73, %74, %75, %76 in 0 : vector<1x8x8xf32>, vector<1x8x8xf32>, vector<1x8x8xf32>, vector<1x8x8xf32>, vector<1x8x8xf32>, vector<1x8x8xf32>, vector<1x8x8xf32>, vector<1x8x8xf32>, vector<1x8x8xf32>, vector<1x8x8xf32>, vector<1x8x8xf32>, vector<1x8x8xf32> -> vector<12x8x8xf32>
    %78 = vector.extract_strided_slice %77 {offsets = [0, 0, 0], sizes = [4, 8, 8], strides = [1, 1, 1]} : vector<12x8x8xf32> to vector<4x8x8xf32>
    %79 = arith.truncf %78 : vector<4x8x8xf32> to vector<4x8x8xbf16>
    %80 = vector.extract_strided_slice %77 {offsets = [4, 0, 0], sizes = [4, 8, 8], strides = [1, 1, 1]} : vector<12x8x8xf32> to vector<4x8x8xf32>
    %81 = arith.truncf %80 : vector<4x8x8xf32> to vector<4x8x8xbf16>
    %82 = vector.extract_strided_slice %77 {offsets = [8, 0, 0], sizes = [4, 8, 8], strides = [1, 1, 1]} : vector<12x8x8xf32> to vector<4x8x8xf32>
    %83 = arith.truncf %82 : vector<4x8x8xf32> to vector<4x8x8xbf16>
    "tpu.trace_start"() <{level = 10 : i32, message = "hqd,hkd->hqk"}> : () -> ()
    %cst_26 = arith.constant dense<0.000000e+00> : vector<4x8x8xf32>
    %84 = tpu.matmul %79, %81, %cst_26 {dimension_numbers = #tpu.dot_dimension_numbers<[2], [2], [1], [1], [0, 0, 0, 1, 1, 1], [0], [0]>} : vector<4x8x8xbf16>, vector<4x8x8xbf16>, vector<4x8x8xf32> -> vector<4x8x8xf32>
    "tpu.trace_stop"() : () -> ()
    %85 = vector.broadcast %18 : vector<1x8x8xf32> to vector<4x8x8xf32>
    %86 = arith.addf %84, %85 : vector<4x8x8xf32>
    %cst_27 = arith.constant dense<0xFF800000> : vector<4x8xf32>
    %87 = vector.multi_reduction <maximumf>, %86, %cst_27 [2] : vector<4x8x8xf32> to vector<4x8xf32>
    %88 = vector.shape_cast %87 : vector<4x8xf32> to vector<4x8x1xf32>
    %89 = vector.broadcast %88 : vector<4x8x1xf32> to vector<4x8x8xf32>
    %90 = arith.subf %86, %89 : vector<4x8x8xf32>
    %91 = math.exp %90 : vector<4x8x8xf32>
    %cst_28 = arith.constant dense<0.000000e+00> : vector<4x8xf32>
    %92 = vector.multi_reduction <add>, %91, %cst_28 [2] : vector<4x8x8xf32> to vector<4x8xf32>
    %93 = vector.shape_cast %92 : vector<4x8xf32> to vector<4x8x1xf32>
    %94 = tpu.reciprocal %93 {approx = true} : vector<4x8x1xf32> -> vector<4x8x1xf32>
    %95 = vector.broadcast %94 : vector<4x8x1xf32> to vector<4x8x8xf32>
    %96 = arith.mulf %91, %95 : vector<4x8x8xf32>
    %97 = arith.truncf %96 : vector<4x8x8xf32> to vector<4x8x8xbf16>
    "tpu.trace_start"() <{level = 10 : i32, message = "hqk,hkd->hqd"}> : () -> ()
    %cst_29 = arith.constant dense<0.000000e+00> : vector<4x8x8xf32>
    %98 = tpu.matmul %97, %83, %cst_29 {dimension_numbers = #tpu.dot_dimension_numbers<[2], [1], [1], [2], [0, 0, 0, 1, 1, 2], [0], [0]>} : vector<4x8x8xbf16>, vector<4x8x8xbf16>, vector<4x8x8xf32> -> vector<4x8x8xf32>
    "tpu.trace_stop"() : () -> ()
    %99 = vector.extract_strided_slice %98 {offsets = [0, 0, 0], sizes = [1, 8, 8], strides = [1, 1, 1]} : vector<4x8x8xf32> to vector<1x8x8xf32>
    %100 = vector.shape_cast %99 : vector<1x8x8xf32> to vector<8x8xf32>
    %101 = vector.extract_strided_slice %98 {offsets = [1, 0, 0], sizes = [1, 8, 8], strides = [1, 1, 1]} : vector<4x8x8xf32> to vector<1x8x8xf32>
    %102 = vector.shape_cast %101 : vector<1x8x8xf32> to vector<8x8xf32>
    %103 = vector.extract_strided_slice %98 {offsets = [2, 0, 0], sizes = [1, 8, 8], strides = [1, 1, 1]} : vector<4x8x8xf32> to vector<1x8x8xf32>
    %104 = vector.shape_cast %103 : vector<1x8x8xf32> to vector<8x8xf32>
    %105 = vector.extract_strided_slice %98 {offsets = [3, 0, 0], sizes = [1, 8, 8], strides = [1, 1, 1]} : vector<4x8x8xf32> to vector<1x8x8xf32>
    %106 = vector.shape_cast %105 : vector<1x8x8xf32> to vector<8x8xf32>
    %107 = tpu.concatenate %100, %102, %104, %106 in 1 : vector<8x8xf32>, vector<8x8xf32>, vector<8x8xf32>, vector<8x8xf32> -> vector<8x32xf32>
    %108 = arith.truncf %107 : vector<8x32xf32> to vector<8x32xbf16>
    %c0_30 = arith.constant 0 : index
    %c0_31 = arith.constant 0 : index
    %c0_32 = arith.constant 0 : index
    %109 = vector.load %arg8[%c0_30, %c0_31, %c0_32] : memref<2x32x32xbf16, #tpu.memory_space<vmem>>, vector<1x32x32xbf16>
    %110 = vector.shape_cast %109 : vector<1x32x32xbf16> to vector<32x32xbf16>
    %cst_33 = arith.constant dense<0.000000e+00> : vector<8x32xf32>
    %111 = tpu.matmul %108, %110, %cst_33 {dimension_numbers = #tpu.dot_dimension_numbers<[1], [0], [0], [1], [0, 0, 1, 1], [], []>} : vector<8x32xbf16>, vector<32x32xbf16>, vector<8x32xf32> -> vector<8x32xf32>
    %112 = arith.addf %11, %111 : vector<8x32xf32>
    %c0_34 = arith.constant 0 : index
    %c0_35 = arith.constant 0 : index
    %c0_36 = arith.constant 0 : index
    %113 = vector.load %arg9[%c0_34, %c0_35, %c0_36] : memref<2x1x32xf32, #tpu.memory_space<vmem>>, vector<1x1x32xf32>
    %114 = vector.shape_cast %113 : vector<1x1x32xf32> to vector<1x32xf32>
    %115 = vector.broadcast %114 : vector<1x32xf32> to vector<8x32xf32>
    %116 = arith.addf %112, %115 : vector<8x32xf32>
    %c0_37 = arith.constant 0 : index
    %c0_38 = arith.constant 0 : index
    %c0_39 = arith.constant 0 : index
    %117 = vector.load %arg10[%c0_37, %c0_38, %c0_39] : memref<2x1x32xf32, #tpu.memory_space<vmem>>, vector<1x1x32xf32>
    %118 = vector.shape_cast %117 : vector<1x1x32xf32> to vector<1x32xf32>
    %c0_40 = arith.constant 0 : index
    %c0_41 = arith.constant 0 : index
    %c0_42 = arith.constant 0 : index
    %119 = vector.load %arg11[%c0_40, %c0_41, %c0_42] : memref<2x1x32xf32, #tpu.memory_space<vmem>>, vector<1x1x32xf32>
    %120 = vector.shape_cast %119 : vector<1x1x32xf32> to vector<1x32xf32>
    %cst_43 = arith.constant dense<0.000000e+00> : vector<8xf32>
    %121 = vector.multi_reduction <add>, %116, %cst_43 [1] : vector<8x32xf32> to vector<8xf32>
    %122 = vector.shape_cast %121 : vector<8xf32> to vector<8x1xf32>
    %cst_44 = arith.constant 3.200000e+01 : f32
    %123 = vector.broadcast %cst_44 : f32 to vector<8x1xf32>
    %124 = arith.divf %122, %123 : vector<8x1xf32>
    %125 = vector.broadcast %124 : vector<8x1xf32> to vector<8x32xf32>
    %126 = arith.subf %116, %125 : vector<8x32xf32>
    %127 = arith.mulf %126, %126 : vector<8x32xf32>
    %cst_45 = arith.constant dense<0.000000e+00> : vector<8xf32>
    %128 = vector.multi_reduction <add>, %127, %cst_45 [1] : vector<8x32xf32> to vector<8xf32>
    %129 = vector.shape_cast %128 : vector<8xf32> to vector<8x1xf32>
    %cst_46 = arith.constant 3.200000e+01 : f32
    %130 = vector.broadcast %cst_46 : f32 to vector<8x1xf32>
    %131 = arith.divf %129, %130 : vector<8x1xf32>
    %132 = vector.broadcast %124 : vector<8x1xf32> to vector<8x32xf32>
    %133 = arith.subf %116, %132 : vector<8x32xf32>
    %cst_47 = arith.constant 9.99999974E-6 : f32
    %134 = vector.broadcast %cst_47 : f32 to vector<8x1xf32>
    %135 = arith.addf %131, %134 : vector<8x1xf32>
    %136 = math.rsqrt %135 : vector<8x1xf32>
    %137 = vector.broadcast %136 : vector<8x1xf32> to vector<8x32xf32>
    %138 = arith.mulf %133, %137 : vector<8x32xf32>
    %139 = vector.broadcast %118 : vector<1x32xf32> to vector<8x32xf32>
    %140 = arith.mulf %138, %139 : vector<8x32xf32>
    %141 = vector.broadcast %120 : vector<1x32xf32> to vector<8x32xf32>
    %142 = arith.addf %140, %141 : vector<8x32xf32>
    %143 = arith.truncf %142 : vector<8x32xf32> to vector<8x32xbf16>
    %c0_48 = arith.constant 0 : index
    %c0_49 = arith.constant 0 : index
    %c0_50 = arith.constant 0 : index
    %144 = vector.load %arg12[%c0_48, %c0_49, %c0_50] : memref<2x32x128xbf16, #tpu.memory_space<vmem>>, vector<1x32x128xbf16>
    %145 = vector.shape_cast %144 : vector<1x32x128xbf16> to vector<32x128xbf16>
    %cst_51 = arith.constant dense<0.000000e+00> : vector<8x128xf32>
    %146 = tpu.matmul %143, %145, %cst_51 {dimension_numbers = #tpu.dot_dimension_numbers<[1], [0], [0], [1], [0, 0, 1, 1], [], []>} : vector<8x32xbf16>, vector<32x128xbf16>, vector<8x128xf32> -> vector<8x128xf32>
    %c0_52 = arith.constant 0 : index
    %c0_53 = arith.constant 0 : index
    %c0_54 = arith.constant 0 : index
    %147 = vector.load %arg13[%c0_52, %c0_53, %c0_54] : memref<2x1x128xf32, #tpu.memory_space<vmem>>, vector<1x1x128xf32>
    %148 = vector.shape_cast %147 : vector<1x1x128xf32> to vector<1x128xf32>
    %149 = vector.broadcast %148 : vector<1x128xf32> to vector<8x128xf32>
    %150 = arith.addf %146, %149 : vector<8x128xf32>
    %cst_55 = arith.constant 1.702000e+00 : f32
    %151 = vector.broadcast %cst_55 : f32 to vector<8x128xf32>
    %152 = arith.mulf %151, %150 : vector<8x128xf32>
    %153 = arith.negf %152 : vector<8x128xf32>
    %154 = math.exp %153 : vector<8x128xf32>
    %cst_56 = arith.constant 1.000000e+00 : f32
    %155 = vector.broadcast %cst_56 : f32 to vector<8x128xf32>
    %156 = arith.addf %155, %154 : vector<8x128xf32>
    %157 = arith.divf %155, %156 : vector<8x128xf32>
    %158 = arith.mulf %150, %157 : vector<8x128xf32>
    %159 = arith.truncf %158 : vector<8x128xf32> to vector<8x128xbf16>
    %c0_57 = arith.constant 0 : index
    %c0_58 = arith.constant 0 : index
    %c0_59 = arith.constant 0 : index
    %160 = vector.load %arg14[%c0_57, %c0_58, %c0_59] : memref<2x128x32xbf16, #tpu.memory_space<vmem>>, vector<1x128x32xbf16>
    %161 = vector.shape_cast %160 : vector<1x128x32xbf16> to vector<128x32xbf16>
    %cst_60 = arith.constant dense<0.000000e+00> : vector<8x32xf32>
    %162 = tpu.matmul %159, %161, %cst_60 {dimension_numbers = #tpu.dot_dimension_numbers<[1], [0], [0], [1], [0, 0, 1, 1], [], []>} : vector<8x128xbf16>, vector<128x32xbf16>, vector<8x32xf32> -> vector<8x32xf32>
    %163 = arith.addf %116, %162 : vector<8x32xf32>
    %c0_61 = arith.constant 0 : index
    %c0_62 = arith.constant 0 : index
    %c0_63 = arith.constant 0 : index
    %164 = vector.load %arg15[%c0_61, %c0_62, %c0_63] : memref<2x1x32xf32, #tpu.memory_space<vmem>>, vector<1x1x32xf32>
    %165 = vector.shape_cast %164 : vector<1x1x32xf32> to vector<1x32xf32>
    %166 = vector.broadcast %165 : vector<1x32xf32> to vector<8x32xf32>
    %167 = arith.addf %163, %166 : vector<8x32xf32>
    %c1 = arith.constant 1 : index
    %c0_64 = arith.constant 0 : index
    %c0_65 = arith.constant 0 : index
    %168 = vector.load %arg4[%c1, %c0_64, %c0_65] : memref<2x1x32xf32, #tpu.memory_space<vmem>>, vector<1x1x32xf32>
    %169 = vector.shape_cast %168 : vector<1x1x32xf32> to vector<1x32xf32>
    %c1_66 = arith.constant 1 : index
    %c0_67 = arith.constant 0 : index
    %c0_68 = arith.constant 0 : index
    %170 = vector.load %arg5[%c1_66, %c0_67, %c0_68] : memref<2x1x32xf32, #tpu.memory_space<vmem>>, vector<1x1x32xf32>
    %171 = vector.shape_cast %170 : vector<1x1x32xf32> to vector<1x32xf32>
    %cst_69 = arith.constant dense<0.000000e+00> : vector<8xf32>
    %172 = vector.multi_reduction <add>, %167, %cst_69 [1] : vector<8x32xf32> to vector<8xf32>
    %173 = vector.shape_cast %172 : vector<8xf32> to vector<8x1xf32>
    %cst_70 = arith.constant 3.200000e+01 : f32
    %174 = vector.broadcast %cst_70 : f32 to vector<8x1xf32>
    %175 = arith.divf %173, %174 : vector<8x1xf32>
    %176 = vector.broadcast %175 : vector<8x1xf32> to vector<8x32xf32>
    %177 = arith.subf %167, %176 : vector<8x32xf32>
    %178 = arith.mulf %177, %177 : vector<8x32xf32>
    %cst_71 = arith.constant dense<0.000000e+00> : vector<8xf32>
    %179 = vector.multi_reduction <add>, %178, %cst_71 [1] : vector<8x32xf32> to vector<8xf32>
    %180 = vector.shape_cast %179 : vector<8xf32> to vector<8x1xf32>
    %cst_72 = arith.constant 3.200000e+01 : f32
    %181 = vector.broadcast %cst_72 : f32 to vector<8x1xf32>
    %182 = arith.divf %180, %181 : vector<8x1xf32>
    %183 = vector.broadcast %175 : vector<8x1xf32> to vector<8x32xf32>
    %184 = arith.subf %167, %183 : vector<8x32xf32>
    %cst_73 = arith.constant 9.99999974E-6 : f32
    %185 = vector.broadcast %cst_73 : f32 to vector<8x1xf32>
    %186 = arith.addf %182, %185 : vector<8x1xf32>
    %187 = math.rsqrt %186 : vector<8x1xf32>
    %188 = vector.broadcast %187 : vector<8x1xf32> to vector<8x32xf32>
    %189 = arith.mulf %184, %188 : vector<8x32xf32>
    %190 = vector.broadcast %169 : vector<1x32xf32> to vector<8x32xf32>
    %191 = arith.mulf %189, %190 : vector<8x32xf32>
    %192 = vector.broadcast %171 : vector<1x32xf32> to vector<8x32xf32>
    %193 = arith.addf %191, %192 : vector<8x32xf32>
    %194 = arith.truncf %193 : vector<8x32xf32> to vector<8x32xbf16>
    %c1_74 = arith.constant 1 : index
    %c0_75 = arith.constant 0 : index
    %c0_76 = arith.constant 0 : index
    %195 = vector.load %arg6[%c1_74, %c0_75, %c0_76] : memref<2x32x96xbf16, #tpu.memory_space<vmem>>, vector<1x32x96xbf16>
    %196 = vector.shape_cast %195 : vector<1x32x96xbf16> to vector<32x96xbf16>
    %cst_77 = arith.constant dense<0.000000e+00> : vector<8x96xf32>
    %197 = tpu.matmul %194, %196, %cst_77 {dimension_numbers = #tpu.dot_dimension_numbers<[1], [0], [0], [1], [0, 0, 1, 1], [], []>} : vector<8x32xbf16>, vector<32x96xbf16>, vector<8x96xf32> -> vector<8x96xf32>
    %c1_78 = arith.constant 1 : index
    %c0_79 = arith.constant 0 : index
    %c0_80 = arith.constant 0 : index
    %198 = vector.load %arg7[%c1_78, %c0_79, %c0_80] : memref<2x1x96xf32, #tpu.memory_space<vmem>>, vector<1x1x96xf32>
    %199 = vector.shape_cast %198 : vector<1x1x96xf32> to vector<1x96xf32>
    %200 = vector.broadcast %199 : vector<1x96xf32> to vector<8x96xf32>
    %201 = arith.addf %197, %200 : vector<8x96xf32>
    %202 = vector.extract_strided_slice %201 {offsets = [0, 0], sizes = [8, 8], strides = [1, 1]} : vector<8x96xf32> to vector<8x8xf32>
    %203 = vector.extract_strided_slice %201 {offsets = [0, 8], sizes = [8, 8], strides = [1, 1]} : vector<8x96xf32> to vector<8x8xf32>
    %204 = vector.extract_strided_slice %201 {offsets = [0, 16], sizes = [8, 8], strides = [1, 1]} : vector<8x96xf32> to vector<8x8xf32>
    %205 = vector.extract_strided_slice %201 {offsets = [0, 24], sizes = [8, 8], strides = [1, 1]} : vector<8x96xf32> to vector<8x8xf32>
    %206 = vector.extract_strided_slice %201 {offsets = [0, 32], sizes = [8, 8], strides = [1, 1]} : vector<8x96xf32> to vector<8x8xf32>
    %207 = vector.extract_strided_slice %201 {offsets = [0, 40], sizes = [8, 8], strides = [1, 1]} : vector<8x96xf32> to vector<8x8xf32>
    %208 = vector.extract_strided_slice %201 {offsets = [0, 48], sizes = [8, 8], strides = [1, 1]} : vector<8x96xf32> to vector<8x8xf32>
    %209 = vector.extract_strided_slice %201 {offsets = [0, 56], sizes = [8, 8], strides = [1, 1]} : vector<8x96xf32> to vector<8x8xf32>
    %210 = vector.extract_strided_slice %201 {offsets = [0, 64], sizes = [8, 8], strides = [1, 1]} : vector<8x96xf32> to vector<8x8xf32>
    %211 = vector.extract_strided_slice %201 {offsets = [0, 72], sizes = [8, 8], strides = [1, 1]} : vector<8x96xf32> to vector<8x8xf32>
    %212 = vector.extract_strided_slice %201 {offsets = [0, 80], sizes = [8, 8], strides = [1, 1]} : vector<8x96xf32> to vector<8x8xf32>
    %213 = vector.extract_strided_slice %201 {offsets = [0, 88], sizes = [8, 8], strides = [1, 1]} : vector<8x96xf32> to vector<8x8xf32>
    %214 = vector.shape_cast %202 : vector<8x8xf32> to vector<1x8x8xf32>
    %215 = vector.shape_cast %203 : vector<8x8xf32> to vector<1x8x8xf32>
    %216 = vector.shape_cast %204 : vector<8x8xf32> to vector<1x8x8xf32>
    %217 = vector.shape_cast %205 : vector<8x8xf32> to vector<1x8x8xf32>
    %218 = vector.shape_cast %206 : vector<8x8xf32> to vector<1x8x8xf32>
    %219 = vector.shape_cast %207 : vector<8x8xf32> to vector<1x8x8xf32>
    %220 = vector.shape_cast %208 : vector<8x8xf32> to vector<1x8x8xf32>
    %221 = vector.shape_cast %209 : vector<8x8xf32> to vector<1x8x8xf32>
    %222 = vector.shape_cast %210 : vector<8x8xf32> to vector<1x8x8xf32>
    %223 = vector.shape_cast %211 : vector<8x8xf32> to vector<1x8x8xf32>
    %224 = vector.shape_cast %212 : vector<8x8xf32> to vector<1x8x8xf32>
    %225 = vector.shape_cast %213 : vector<8x8xf32> to vector<1x8x8xf32>
    %226 = tpu.concatenate %214, %215, %216, %217, %218, %219, %220, %221, %222, %223, %224, %225 in 0 : vector<1x8x8xf32>, vector<1x8x8xf32>, vector<1x8x8xf32>, vector<1x8x8xf32>, vector<1x8x8xf32>, vector<1x8x8xf32>, vector<1x8x8xf32>, vector<1x8x8xf32>, vector<1x8x8xf32>, vector<1x8x8xf32>, vector<1x8x8xf32>, vector<1x8x8xf32> -> vector<12x8x8xf32>
    %227 = vector.extract_strided_slice %226 {offsets = [0, 0, 0], sizes = [4, 8, 8], strides = [1, 1, 1]} : vector<12x8x8xf32> to vector<4x8x8xf32>
    %228 = arith.truncf %227 : vector<4x8x8xf32> to vector<4x8x8xbf16>
    %229 = vector.extract_strided_slice %226 {offsets = [4, 0, 0], sizes = [4, 8, 8], strides = [1, 1, 1]} : vector<12x8x8xf32> to vector<4x8x8xf32>
    %230 = arith.truncf %229 : vector<4x8x8xf32> to vector<4x8x8xbf16>
    %231 = vector.extract_strided_slice %226 {offsets = [8, 0, 0], sizes = [4, 8, 8], strides = [1, 1, 1]} : vector<12x8x8xf32> to vector<4x8x8xf32>
    %232 = arith.truncf %231 : vector<4x8x8xf32> to vector<4x8x8xbf16>
    "tpu.trace_start"() <{level = 10 : i32, message = "hqd,hkd->hqk"}> : () -> ()
    %cst_81 = arith.constant dense<0.000000e+00> : vector<4x8x8xf32>
    %233 = tpu.matmul %228, %230, %cst_81 {dimension_numbers = #tpu.dot_dimension_numbers<[2], [2], [1], [1], [0, 0, 0, 1, 1, 1], [0], [0]>} : vector<4x8x8xbf16>, vector<4x8x8xbf16>, vector<4x8x8xf32> -> vector<4x8x8xf32>
    "tpu.trace_stop"() : () -> ()
    %234 = vector.broadcast %18 : vector<1x8x8xf32> to vector<4x8x8xf32>
    %235 = arith.addf %233, %234 : vector<4x8x8xf32>
    %cst_82 = arith.constant dense<0xFF800000> : vector<4x8xf32>
    %236 = vector.multi_reduction <maximumf>, %235, %cst_82 [2] : vector<4x8x8xf32> to vector<4x8xf32>
    %237 = vector.shape_cast %236 : vector<4x8xf32> to vector<4x8x1xf32>
    %238 = vector.broadcast %237 : vector<4x8x1xf32> to vector<4x8x8xf32>
    %239 = arith.subf %235, %238 : vector<4x8x8xf32>
    %240 = math.exp %239 : vector<4x8x8xf32>
    %cst_83 = arith.constant dense<0.000000e+00> : vector<4x8xf32>
    %241 = vector.multi_reduction <add>, %240, %cst_83 [2] : vector<4x8x8xf32> to vector<4x8xf32>
    %242 = vector.shape_cast %241 : vector<4x8xf32> to vector<4x8x1xf32>
    %243 = tpu.reciprocal %242 {approx = true} : vector<4x8x1xf32> -> vector<4x8x1xf32>
    %244 = vector.broadcast %243 : vector<4x8x1xf32> to vector<4x8x8xf32>
    %245 = arith.mulf %240, %244 : vector<4x8x8xf32>
    %246 = arith.truncf %245 : vector<4x8x8xf32> to vector<4x8x8xbf16>
    "tpu.trace_start"() <{level = 10 : i32, message = "hqk,hkd->hqd"}> : () -> ()
    %cst_84 = arith.constant dense<0.000000e+00> : vector<4x8x8xf32>
    %247 = tpu.matmul %246, %232, %cst_84 {dimension_numbers = #tpu.dot_dimension_numbers<[2], [1], [1], [2], [0, 0, 0, 1, 1, 2], [0], [0]>} : vector<4x8x8xbf16>, vector<4x8x8xbf16>, vector<4x8x8xf32> -> vector<4x8x8xf32>
    "tpu.trace_stop"() : () -> ()
    %248 = vector.extract_strided_slice %247 {offsets = [0, 0, 0], sizes = [1, 8, 8], strides = [1, 1, 1]} : vector<4x8x8xf32> to vector<1x8x8xf32>
    %249 = vector.shape_cast %248 : vector<1x8x8xf32> to vector<8x8xf32>
    %250 = vector.extract_strided_slice %247 {offsets = [1, 0, 0], sizes = [1, 8, 8], strides = [1, 1, 1]} : vector<4x8x8xf32> to vector<1x8x8xf32>
    %251 = vector.shape_cast %250 : vector<1x8x8xf32> to vector<8x8xf32>
    %252 = vector.extract_strided_slice %247 {offsets = [2, 0, 0], sizes = [1, 8, 8], strides = [1, 1, 1]} : vector<4x8x8xf32> to vector<1x8x8xf32>
    %253 = vector.shape_cast %252 : vector<1x8x8xf32> to vector<8x8xf32>
    %254 = vector.extract_strided_slice %247 {offsets = [3, 0, 0], sizes = [1, 8, 8], strides = [1, 1, 1]} : vector<4x8x8xf32> to vector<1x8x8xf32>
    %255 = vector.shape_cast %254 : vector<1x8x8xf32> to vector<8x8xf32>
    %256 = tpu.concatenate %249, %251, %253, %255 in 1 : vector<8x8xf32>, vector<8x8xf32>, vector<8x8xf32>, vector<8x8xf32> -> vector<8x32xf32>
    %257 = arith.truncf %256 : vector<8x32xf32> to vector<8x32xbf16>
    %c1_85 = arith.constant 1 : index
    %c0_86 = arith.constant 0 : index
    %c0_87 = arith.constant 0 : index
    %258 = vector.load %arg8[%c1_85, %c0_86, %c0_87] : memref<2x32x32xbf16, #tpu.memory_space<vmem>>, vector<1x32x32xbf16>
    %259 = vector.shape_cast %258 : vector<1x32x32xbf16> to vector<32x32xbf16>
    %cst_88 = arith.constant dense<0.000000e+00> : vector<8x32xf32>
    %260 = tpu.matmul %257, %259, %cst_88 {dimension_numbers = #tpu.dot_dimension_numbers<[1], [0], [0], [1], [0, 0, 1, 1], [], []>} : vector<8x32xbf16>, vector<32x32xbf16>, vector<8x32xf32> -> vector<8x32xf32>
    %261 = arith.addf %167, %260 : vector<8x32xf32>
    %c1_89 = arith.constant 1 : index
    %c0_90 = arith.constant 0 : index
    %c0_91 = arith.constant 0 : index
    %262 = vector.load %arg9[%c1_89, %c0_90, %c0_91] : memref<2x1x32xf32, #tpu.memory_space<vmem>>, vector<1x1x32xf32>
    %263 = vector.shape_cast %262 : vector<1x1x32xf32> to vector<1x32xf32>
    %264 = vector.broadcast %263 : vector<1x32xf32> to vector<8x32xf32>
    %265 = arith.addf %261, %264 : vector<8x32xf32>
    %c1_92 = arith.constant 1 : index
    %c0_93 = arith.constant 0 : index
    %c0_94 = arith.constant 0 : index
    %266 = vector.load %arg10[%c1_92, %c0_93, %c0_94] : memref<2x1x32xf32, #tpu.memory_space<vmem>>, vector<1x1x32xf32>
    %267 = vector.shape_cast %266 : vector<1x1x32xf32> to vector<1x32xf32>
    %c1_95 = arith.constant 1 : index
    %c0_96 = arith.constant 0 : index
    %c0_97 = arith.constant 0 : index
    %268 = vector.load %arg11[%c1_95, %c0_96, %c0_97] : memref<2x1x32xf32, #tpu.memory_space<vmem>>, vector<1x1x32xf32>
    %269 = vector.shape_cast %268 : vector<1x1x32xf32> to vector<1x32xf32>
    %cst_98 = arith.constant dense<0.000000e+00> : vector<8xf32>
    %270 = vector.multi_reduction <add>, %265, %cst_98 [1] : vector<8x32xf32> to vector<8xf32>
    %271 = vector.shape_cast %270 : vector<8xf32> to vector<8x1xf32>
    %cst_99 = arith.constant 3.200000e+01 : f32
    %272 = vector.broadcast %cst_99 : f32 to vector<8x1xf32>
    %273 = arith.divf %271, %272 : vector<8x1xf32>
    %274 = vector.broadcast %273 : vector<8x1xf32> to vector<8x32xf32>
    %275 = arith.subf %265, %274 : vector<8x32xf32>
    %276 = arith.mulf %275, %275 : vector<8x32xf32>
    %cst_100 = arith.constant dense<0.000000e+00> : vector<8xf32>
    %277 = vector.multi_reduction <add>, %276, %cst_100 [1] : vector<8x32xf32> to vector<8xf32>
    %278 = vector.shape_cast %277 : vector<8xf32> to vector<8x1xf32>
    %cst_101 = arith.constant 3.200000e+01 : f32
    %279 = vector.broadcast %cst_101 : f32 to vector<8x1xf32>
    %280 = arith.divf %278, %279 : vector<8x1xf32>
    %281 = vector.broadcast %273 : vector<8x1xf32> to vector<8x32xf32>
    %282 = arith.subf %265, %281 : vector<8x32xf32>
    %cst_102 = arith.constant 9.99999974E-6 : f32
    %283 = vector.broadcast %cst_102 : f32 to vector<8x1xf32>
    %284 = arith.addf %280, %283 : vector<8x1xf32>
    %285 = math.rsqrt %284 : vector<8x1xf32>
    %286 = vector.broadcast %285 : vector<8x1xf32> to vector<8x32xf32>
    %287 = arith.mulf %282, %286 : vector<8x32xf32>
    %288 = vector.broadcast %267 : vector<1x32xf32> to vector<8x32xf32>
    %289 = arith.mulf %287, %288 : vector<8x32xf32>
    %290 = vector.broadcast %269 : vector<1x32xf32> to vector<8x32xf32>
    %291 = arith.addf %289, %290 : vector<8x32xf32>
    %292 = arith.truncf %291 : vector<8x32xf32> to vector<8x32xbf16>
    %c1_103 = arith.constant 1 : index
    %c0_104 = arith.constant 0 : index
    %c0_105 = arith.constant 0 : index
    %293 = vector.load %arg12[%c1_103, %c0_104, %c0_105] : memref<2x32x128xbf16, #tpu.memory_space<vmem>>, vector<1x32x128xbf16>
    %294 = vector.shape_cast %293 : vector<1x32x128xbf16> to vector<32x128xbf16>
    %cst_106 = arith.constant dense<0.000000e+00> : vector<8x128xf32>
    %295 = tpu.matmul %292, %294, %cst_106 {dimension_numbers = #tpu.dot_dimension_numbers<[1], [0], [0], [1], [0, 0, 1, 1], [], []>} : vector<8x32xbf16>, vector<32x128xbf16>, vector<8x128xf32> -> vector<8x128xf32>
    %c1_107 = arith.constant 1 : index
    %c0_108 = arith.constant 0 : index
    %c0_109 = arith.constant 0 : index
    %296 = vector.load %arg13[%c1_107, %c0_108, %c0_109] : memref<2x1x128xf32, #tpu.memory_space<vmem>>, vector<1x1x128xf32>
    %297 = vector.shape_cast %296 : vector<1x1x128xf32> to vector<1x128xf32>
    %298 = vector.broadcast %297 : vector<1x128xf32> to vector<8x128xf32>
    %299 = arith.addf %295, %298 : vector<8x128xf32>
    %cst_110 = arith.constant 1.702000e+00 : f32
    %300 = vector.broadcast %cst_110 : f32 to vector<8x128xf32>
    %301 = arith.mulf %300, %299 : vector<8x128xf32>
    %302 = arith.negf %301 : vector<8x128xf32>
    %303 = math.exp %302 : vector<8x128xf32>
    %cst_111 = arith.constant 1.000000e+00 : f32
    %304 = vector.broadcast %cst_111 : f32 to vector<8x128xf32>
    %305 = arith.addf %304, %303 : vector<8x128xf32>
    %306 = arith.divf %304, %305 : vector<8x128xf32>
    %307 = arith.mulf %299, %306 : vector<8x128xf32>
    %308 = arith.truncf %307 : vector<8x128xf32> to vector<8x128xbf16>
    %c1_112 = arith.constant 1 : index
    %c0_113 = arith.constant 0 : index
    %c0_114 = arith.constant 0 : index
    %309 = vector.load %arg14[%c1_112, %c0_113, %c0_114] : memref<2x128x32xbf16, #tpu.memory_space<vmem>>, vector<1x128x32xbf16>
    %310 = vector.shape_cast %309 : vector<1x128x32xbf16> to vector<128x32xbf16>
    %cst_115 = arith.constant dense<0.000000e+00> : vector<8x32xf32>
    %311 = tpu.matmul %308, %310, %cst_115 {dimension_numbers = #tpu.dot_dimension_numbers<[1], [0], [0], [1], [0, 0, 1, 1], [], []>} : vector<8x128xbf16>, vector<128x32xbf16>, vector<8x32xf32> -> vector<8x32xf32>
    %312 = arith.addf %265, %311 : vector<8x32xf32>
    %c1_116 = arith.constant 1 : index
    %c0_117 = arith.constant 0 : index
    %c0_118 = arith.constant 0 : index
    %313 = vector.load %arg15[%c1_116, %c0_117, %c0_118] : memref<2x1x32xf32, #tpu.memory_space<vmem>>, vector<1x1x32xf32>
    %314 = vector.shape_cast %313 : vector<1x1x32xf32> to vector<1x32xf32>
    %315 = vector.broadcast %314 : vector<1x32xf32> to vector<8x32xf32>
    %316 = arith.addf %312, %315 : vector<8x32xf32>
    %c0_119 = arith.constant 0 : index
    %c0_120 = arith.constant 0 : index
    %317 = vector.load %arg16[%c0_119, %c0_120] : memref<1x32xf32, #tpu.memory_space<vmem>>, vector<1x32xf32>
    %c0_121 = arith.constant 0 : index
    %c0_122 = arith.constant 0 : index
    %318 = vector.load %arg17[%c0_121, %c0_122] : memref<1x32xf32, #tpu.memory_space<vmem>>, vector<1x32xf32>
    %cst_123 = arith.constant dense<0.000000e+00> : vector<8xf32>
    %319 = vector.multi_reduction <add>, %316, %cst_123 [1] : vector<8x32xf32> to vector<8xf32>
    %320 = vector.shape_cast %319 : vector<8xf32> to vector<8x1xf32>
    %cst_124 = arith.constant 3.200000e+01 : f32
    %321 = vector.broadcast %cst_124 : f32 to vector<8x1xf32>
    %322 = arith.divf %320, %321 : vector<8x1xf32>
    %323 = vector.broadcast %322 : vector<8x1xf32> to vector<8x32xf32>
    %324 = arith.subf %316, %323 : vector<8x32xf32>
    %325 = arith.mulf %324, %324 : vector<8x32xf32>
    %cst_125 = arith.constant dense<0.000000e+00> : vector<8xf32>
    %326 = vector.multi_reduction <add>, %325, %cst_125 [1] : vector<8x32xf32> to vector<8xf32>
    %327 = vector.shape_cast %326 : vector<8xf32> to vector<8x1xf32>
    %cst_126 = arith.constant 3.200000e+01 : f32
    %328 = vector.broadcast %cst_126 : f32 to vector<8x1xf32>
    %329 = arith.divf %327, %328 : vector<8x1xf32>
    %330 = vector.broadcast %322 : vector<8x1xf32> to vector<8x32xf32>
    %331 = arith.subf %316, %330 : vector<8x32xf32>
    %cst_127 = arith.constant 9.99999974E-6 : f32
    %332 = vector.broadcast %cst_127 : f32 to vector<8x1xf32>
    %333 = arith.addf %329, %332 : vector<8x1xf32>
    %334 = math.rsqrt %333 : vector<8x1xf32>
    %335 = vector.broadcast %334 : vector<8x1xf32> to vector<8x32xf32>
    %336 = arith.mulf %331, %335 : vector<8x32xf32>
    %337 = vector.broadcast %317 : vector<1x32xf32> to vector<8x32xf32>
    %338 = arith.mulf %336, %337 : vector<8x32xf32>
    %339 = vector.broadcast %318 : vector<1x32xf32> to vector<8x32xf32>
    %340 = arith.addf %338, %339 : vector<8x32xf32>
    %341 = vector.shape_cast %340 : vector<8x32xf32> to vector<1x8x32xf32>
    %c0_128 = arith.constant 0 : index
    %c0_129 = arith.constant 0 : index
    %c0_130 = arith.constant 0 : index
    %342 = vector.load %arg18[%c0_128, %c0_129, %c0_130] : memref<1x8x32xf32, #tpu.memory_space<vmem>>, vector<1x8x32xf32>
    tpu.vector_store %arg18[%c0_128, %c0_129, %c0_130], %341 {strides = array<i32>} : memref<1x8x32xf32, #tpu.memory_space<vmem>>, vector<1x8x32xf32>,
    return
  }
  func.func @transform_0(%arg0: i32) -> (i32, i32, i32) {
    %c0_i32 = arith.constant 0 : i32
    %c0_i32_0 = arith.constant 0 : i32
    %c0_i32_1 = arith.constant 0 : i32
    return %arg0, %c0_i32, %c0_i32_0 : i32, i32, i32
  }
  func.func @transform_1(%arg0: i32) -> (i32, i32) {
    %c0_i32 = arith.constant 0 : i32
    %c0_i32_0 = arith.constant 0 : i32
    %c0_i32_1 = arith.constant 0 : i32
    return %c0_i32, %c0_i32_0 : i32, i32
  }
  func.func @transform_2(%arg0: i32) -> (i32, i32) {
    %c0_i32 = arith.constant 0 : i32
    %c0_i32_0 = arith.constant 0 : i32
    %c0_i32_1 = arith.constant 0 : i32
    return %c0_i32, %c0_i32_0 : i32, i32
  }
  func.func @transform_3(%arg0: i32) -> (i32, i32, i32) {
    %c0_i32 = arith.constant 0 : i32
    %c0_i32_0 = arith.constant 0 : i32
    %c0_i32_1 = arith.constant 0 : i32
    %c0_i32_2 = arith.constant 0 : i32
    return %c0_i32, %c0_i32_0, %c0_i32_1 : i32, i32, i32
  }
  func.func @transform_4(%arg0: i32) -> (i32, i32, i32) {
    %c0_i32 = arith.constant 0 : i32
    %c0_i32_0 = arith.constant 0 : i32
    %c0_i32_1 = arith.constant 0 : i32
    %c0_i32_2 = arith.constant 0 : i32
    return %c0_i32, %c0_i32_0, %c0_i32_1 : i32, i32, i32
  }
  func.func @transform_5(%arg0: i32) -> (i32, i32, i32) {
    %c0_i32 = arith.constant 0 : i32
    %c0_i32_0 = arith.constant 0 : i32
    %c0_i32_1 = arith.constant 0 : i32
    %c0_i32_2 = arith.constant 0 : i32
    return %c0_i32, %c0_i32_0, %c0_i32_1 : i32, i32, i32
  }
  func.func @transform_6(%arg0: i32) -> (i32, i32, i32) {
    %c0_i32 = arith.constant 0 : i32
    %c0_i32_0 = arith.constant 0 : i32
    %c0_i32_1 = arith.constant 0 : i32
    %c0_i32_2 = arith.constant 0 : i32
    return %c0_i32, %c0_i32_0, %c0_i32_1 : i32, i32, i32
  }
  func.func @transform_7(%arg0: i32) -> (i32, i32, i32) {
    %c0_i32 = arith.constant 0 : i32
    %c0_i32_0 = arith.constant 0 : i32
    %c0_i32_1 = arith.constant 0 : i32
    %c0_i32_2 = arith.constant 0 : i32
    return %c0_i32, %c0_i32_0, %c0_i32_1 : i32, i32, i32
  }
  func.func @transform_8(%arg0: i32) -> (i32, i32, i32) {
    %c0_i32 = arith.constant 0 : i32
    %c0_i32_0 = arith.constant 0 : i32
    %c0_i32_1 = arith.constant 0 : i32
    %c0_i32_2 = arith.constant 0 : i32
    return %c0_i32, %c0_i32_0, %c0_i32_1 : i32, i32, i32
  }
  func.func @transform_9(%arg0: i32) -> (i32, i32, i32) {
    %c0_i32 = arith.constant 0 : i32
    %c0_i32_0 = arith.constant 0 : i32
    %c0_i32_1 = arith.constant 0 : i32
    %c0_i32_2 = arith.constant 0 : i32
    return %c0_i32, %c0_i32_0, %c0_i32_1 : i32, i32, i32
  }
  func.func @transform_10(%arg0: i32) -> (i32, i32, i32) {
    %c0_i32 = arith.constant 0 : i32
    %c0_i32_0 = arith.constant 0 : i32
    %c0_i32_1 = arith.constant 0 : i32
    %c0_i32_2 = arith.constant 0 : i32
    return %c0_i32, %c0_i32_0, %c0_i32_1 : i32, i32, i32
  }
  func.func @transform_11(%arg0: i32) -> (i32, i32, i32) {
    %c0_i32 = arith.constant 0 : i32
    %c0_i32_0 = arith.constant 0 : i32
    %c0_i32_1 = arith.constant 0 : i32
    %c0_i32_2 = arith.constant 0 : i32
    return %c0_i32, %c0_i32_0, %c0_i32_1 : i32, i32, i32
  }
  func.func @transform_12(%arg0: i32) -> (i32, i32, i32) {
    %c0_i32 = arith.constant 0 : i32
    %c0_i32_0 = arith.constant 0 : i32
    %c0_i32_1 = arith.constant 0 : i32
    %c0_i32_2 = arith.constant 0 : i32
    return %c0_i32, %c0_i32_0, %c0_i32_1 : i32, i32, i32
  }
  func.func @transform_13(%arg0: i32) -> (i32, i32, i32) {
    %c0_i32 = arith.constant 0 : i32
    %c0_i32_0 = arith.constant 0 : i32
    %c0_i32_1 = arith.constant 0 : i32
    %c0_i32_2 = arith.constant 0 : i32
    return %c0_i32, %c0_i32_0, %c0_i32_1 : i32, i32, i32
  }
  func.func @transform_14(%arg0: i32) -> (i32, i32, i32) {
    %c0_i32 = arith.constant 0 : i32
    %c0_i32_0 = arith.constant 0 : i32
    %c0_i32_1 = arith.constant 0 : i32
    %c0_i32_2 = arith.constant 0 : i32
    return %c0_i32, %c0_i32_0, %c0_i32_1 : i32, i32, i32
  }
  func.func @transform_15(%arg0: i32) -> (i32, i32) {
    %c0_i32 = arith.constant 0 : i32
    %c0_i32_0 = arith.constant 0 : i32
    %c0_i32_1 = arith.constant 0 : i32
    return %c0_i32, %c0_i32_0 : i32, i32
  }
  func.func @transform_16(%arg0: i32) -> (i32, i32) {
    %c0_i32 = arith.constant 0 : i32
    %c0_i32_0 = arith.constant 0 : i32
    %c0_i32_1 = arith.constant 0 : i32
    return %c0_i32, %c0_i32_0 : i32, i32
  }
  func.func @transform_17(%arg0: i32) -> (i32, i32, i32) {
    %c0_i32 = arith.constant 0 : i32
    %c0_i32_0 = arith.constant 0 : i32
    %c0_i32_1 = arith.constant 0 : i32
    return %arg0, %c0_i32, %c0_i32_0 : i32, i32, i32
  }
}

</mosaic_0001>

<bundles_post_ra>
// kernel: clip_text_encode.1
= control target key start
LH: loop header
LB: loop body
LE: loop exit
PB: predicated region body
PF: predicated region fallthrough
CT: control target
= control target key end

     0   :  { %s3748_s0 = inlined_call_operand.vmem [shape: s32[2,8,1], index: 0, kind: input, shape index: {}]   ;;  %s3749_s1 = inlined_call_operand.vmem [shape: bf16[128,32], index: 1, kind: input, shape index: {}]   ;;  %s3750_s2 = inlined_call_operand.vmem [shape: f32[8,32], index: 2, kind: input, shape index: {}]   ;;  %s3751_s3 = inlined_call_operand.vmem [shape: f32[2,1,32], index: 3, kind: input, shape index: {}]   ;;  %s3752_s4 = inlined_call_operand.vmem [shape: f32[2,1,32], index: 4, kind: input, shape index: {}]   ;;  %s3753_s5 = inlined_call_operand.vmem [shape: bf16[2,32,96], index: 5, kind: input, shape index: {}]   ;;  %s3754_s6 = inlined_call_operand.vmem [shape: f32[2,1,96], index: 6, kind: input, shape index: {}]   ;;  %s3755_s7 = inlined_call_operand.vmem [shape: bf16[2,32,32], index: 7, kind: input, shape index: {}]   ;;  %s3756_s8 = inlined_call_operand.vmem [shape: f32[2,1,32], index: 8, kind: input, shape index: {}]   ;;  %s3757_s9 = inlined_call_operand.vmem [shape: f32[2,1,32], index: 9, kind: input, shape index: {}]   ;;  %s3758_s10 = inlined_call_operand.vmem [shape: f32[2,1,32], index: 10, kind: input, shape index: {}]   ;;  %s3759_s11 = inlined_call_operand.vmem [shape: bf16[2,32,128], index: 11, kind: input, shape index: {}]   ;;  %s3760_s12 = inlined_call_operand.vmem [shape: f32[2,1,128], index: 12, kind: input, shape index: {}]   ;;  %s3761_s13 = inlined_call_operand.vmem [shape: bf16[2,128,32], index: 13, kind: input, shape index: {}]   ;;  %s3762_s14 = inlined_call_operand.vmem [shape: f32[2,1,32], index: 14, kind: input, shape index: {}]   ;;  %s3763_s15 = inlined_call_operand.vmem [shape: f32[1,32], index: 15, kind: input, shape index: {}]   ;;  %s3764_s16 = inlined_call_operand.vmem [shape: f32[1,32], index: 16, kind: input, shape index: {}]   ;;  %s3765_s17 = inlined_call_operand.hbm [shape: f32[2,8,32], index: 17, kind: output, shape index: {}]  }
   0x1   :  { %3783 = sst [smem:[#allocation10_spill]] %s3748_s0 }
   0x2   :  { %3784 = sst [smem:[#allocation11_spill]] %s3749_s1 }
   0x3   :  { %3785 = sst [smem:[#allocation12_spill]] %s3750_s2 }
   0x4   :  { %3786 = sst [smem:[#allocation13_spill]] %s3751_s3 }
   0x5   :  { %3787 = sst [smem:[#allocation14_spill]] %s3752_s4 }
   0x6   :  { %22 = vsyncpa [#allocation3], 0 }
   0x7   :  { %24 = vsyncpa [#allocation3 + $0x1], 0  ;;  %s3228_s24 = smov 0   ;;  %s3230_s25 = smov 0  }
   0x8   :  { %s3232_s26 = smov 0   ;;  %s3234_s27 = smov 0  }
   0x9 LB: > { %3788 = sst [smem:[#allocation5_spill]] %s3105_s24  ;;  %s3249_s28 = sadd.s32 4294967295, %s3117_s27   ;;  %s3117_s27 = sphi %s3234_s27, %s3813_s27   ;;  %s3113_s26 = sphi %s3232_s26, %s3815_s26   ;;  %s3109_s25 = sphi %s3230_s25, %s3817_s25   ;;  %s3105_s24 = sphi %s3228_s24, %s3816_s24  }
   0xa   : > { %3789 = sst [smem:[#allocation6_spill]] %s3113_s26  ;;  %s2505_s29 = sadd.s32 4294967294, %s3117_s27  }
   0xb   : > { %s3253_s0 = sadd.s32 1, %s3117_s27   ;;  %s399_s30 = sadd.s32 1, %s3113_s26 }
   0xc   : > { %3790 = sst [smem:[#allocation7_spill]] %s3253_s0  ;;  %s396_s18 = ssub.s32 %s3117_s27, %s3253_s0 }
   0xd   : > { %p409_p0 = scmp.ne.s32.totalorder %s3113_s26, %s3109_s25  ;;  %p397_p1 = scmp.eq.s32.totalorder %s396_s18, 0 }
   0xe   : > { %p410_p2 = scmp.eq.s32.totalorder %s3249_s28, 1  ;;  %p415_p3 = scmp.ne.s32.totalorder %s3109_s25, %s3105_s24 }
   0xf   : > { %p416_p4 = scmp.eq.s32.totalorder %s2505_s29, 1  ;;  %p2508_p7 = scmp.ge.s32.totalorder %s3117_s27, 1 }
  0x10   : > { %s3264_s19 = scalar_select %p397_p1, %s3113_s26, %s399_s30  }
  0x11   : > { %p3266_p5 = por %p410_p2, %p409_p0  ;;  %p3270_p6 = por %p416_p4, %p415_p3 }
  0x12   : > { %3791 = sst [smem:[#allocation8_spill]] %s3264_s19  ;;  %p489_p8 = scmp.lt.s32.totalorder %s3117_s27, 3 }
  0x13   : > { %s3793_s20 = scalar_select %p3270_p6, 1, 0 }
  0x14   : > { %p490_p9 = pnand %p2508_p7, %p489_p8 }
  0x15   : > { %3794 = sst [smem:[#allocation9_spill]] %s3793_s20  ;;  %p540_p10 = scmp.lt.s32.totalorder (!%p490_p9), %s3249_s28, 1 }
  0x16   : > { %493 = sbr.rel (%p490_p9) target bundleno = 5527 (0x1597), region = 88  ;;  %s3795_s23 = sld [smem:[#allocation11_spill]] (!%p490_p9) }
  0x17   : > { %s3796_s21 = sld [smem:[#allocation10_spill]] (!%p490_p9)  ;;  %s3781_s26 = smov (!%p490_p9), 72  }
  0x18   : > { %s3797_s2 = sld [smem:[#allocation12_spill]] (!%p490_p9)  ;;  %s3124_s24 = smov (!%p490_p9), 96  }
  0x19   : > { %s3798_s3 = sld [smem:[#allocation13_spill]] (!%p490_p9)  ;;  %s3125_s0 = smov (!%p490_p9), 88  }
  0x1a   : > { %s3799_s4 = sld [smem:[#allocation14_spill]] (!%p490_p9)  ;;  %s3782_s20 = smov (!%p490_p9), 80  }
  0x1b   : > { %v3119_v1 = vmov 0   ;;  %v3120_v2 = vmov 0.0   ;;  %s541_s29 = scalar_select %p540_p10, %s3249_s28, 1  ;;  %vm3121_vm0 = vmmov 0   ;;  %v546_v11 = vlaneseq  ;;  %v2979_v27 = vld [vmem:[%s3753_s5 + $0x8] sm:$0xff]   ;;  %v2980_v28 = vld [vmem:[%s3753_s5] sm:$0xff]  }
  0x1c   : > { %v2971_v0 = vld [vmem:[%s3795_s23 + $0x38] sm:$0xff]   ;;  %2970 = vset.pattern.permute.xlu0 %v3119_v1  ;;  %2709 = vmatprep.subr.bf16.mxu0 %v3120_v2  ;;  %v2972_v3 = vld [vmem:[%s3795_s23 + $0x30] sm:$0xff]   ;;  %v2973_v5 = vld [vmem:[%s3795_s23 + $0x28] sm:$0xff]   ;;  %v3122_v14 = vmov 1.0|1.0   ;;  %vm666_vm3 = vcmask 261120  }
  0x1d   : > { %2710 = vmatpush3.bf16.msra.mxu0 %v2971_v0  ;;  %2729 = vmatprep.subr.bf16.mxu1 %v3120_v2  ;;  %s2510_s19 = sshll.u32 %s541_s29, 3  ;;  %v2974_v6 = vld [vmem:[%s3795_s23 + $0x20] sm:$0xff]   ;;  %v2975_v7 = vld [vmem:[%s3795_s23 + $0x18] sm:$0xff]   ;;  %v2976_v8 = vld [vmem:[%s3795_s23 + $0x10] sm:$0xff]   ;;  %v3320_v12 = vand.u32 127, %v546_v11  ;;  %s3777_s18 = smov 112  }
  0x1e   : > { %2711 = vmatprep.subr.bf16.mxu0 %v3120_v2  ;;  %s543_s22 = scalar_lea.vmem %s3796_s21, %s2510_s19  ;;  %2725 = vmatprep.mubr.msk.bf16.mxu0 %vm3121_vm0, %v3120_v2  ;;  %v2977_v9 = vld [vmem:[%s3795_s23 + $0x8] sm:$0xff]   ;;  %v2978_v10 = vld [vmem:[%s3795_s23] sm:$0xff]   ;;  %s3126_s19 = smov 120   ;;  %vm808_vm4 = vcmask 64512   ;;  %v661_v0 = vshrl.u32 %v546_v11, 7  ;;  %vm1044_vm6 = vcmask 1043456  }
  0x1f   : > { %v545_v4 = vld [vmem:[%s543_s22] sm:$0xff]  ;;  %2733 = vmatprep.mubr.msk.bf16.mxu1 %vm3121_vm0, %v3120_v2  ;;  %2730 = vmatpush3.bf16.msra.mxu1 %v2979_v27  ;;  %s3776_s21 = smov 104   ;;  %s3772_s22 = smov 64   ;;  %vm1239_vm7 = vcmask 130048   ;;  %vm1241_vm8 = vcmask 195584  }
  0x20   : > { %549 = vperm.xlu0 %2970, %v545_v4   ;;  %v571_v15 = vld [vmem:[%s3797_s2] sm:$0xff]  ;;  %2731 = vmatprep.subr.bf16.mxu1 %v3120_v2  ;;  %vm662_vm5 = vcmp.gt.s32.totalorder %v3320_v12, %v661_v0  ;;  %s3775_s29 = smov 48   ;;  %s3773_s30 = smov 40  }
  0x21   : > { %2712 = vmatpush3.bf16.msra.mxu0 %v2972_v3  ;;  %v2522_v33 = vld [vmem:[%s3798_s3] ss:$0 sm:$0xff]  ;;  %v3395_v1 = vsel %vm662_vm5, -1e+09, %v3120_v2 }
  0x22   : > { %2713 = vmatprep.subr.bf16.mxu0 %v3120_v2  ;;  %v2523_v35 = vld [vmem:[%s3799_s4] ss:$0 sm:$0xff] }
  0x23   : > { %2732 = vmatpush3.bf16.msra.mxu1 %v2980_v28  ;;  %v2524_v39 = vld [vmem:[%s3754_s6] ss:$0 sm:$0xff] }
  0x24   : > { %2737 = vmatprep.subr.bf16.mxu1 %v3120_v2 }
  0x25   : > { %2714 = vmatpush3.bf16.msra.mxu0 %v2973_v5 }
  0x26   : > { %2715 = vmatprep.subr.bf16.mxu0 %v3120_v2 }
  0x29   : > { %2716 = vmatpush3.bf16.msra.mxu0 %v2974_v6 }
  0x2a   : > { %2717 = vmatprep.subr.bf16.mxu0 %v3120_v2 }
  0x2d   : > { %2718 = vmatpush3.bf16.msra.mxu0 %v2975_v7 }
  0x2e   : > { %2719 = vmatprep.subr.bf16.mxu0 %v3120_v2 }
  0x31   : > { %2720 = vmatpush3.bf16.msra.mxu0 %v2976_v8 }
  0x32   : > { %2721 = vmatprep.subr.bf16.mxu0 %v3120_v2 }
  0x35   : > { %2722 = vmatpush3.bf16.msra.mxu0 %v2977_v9 }
  0x36   : > { %2723 = vmatprep.subr.bf16.mxu0 %v3120_v2 }
  0x39   : > { %2724 = vmatpush3.bf16.msra.mxu0 %v2978_v10 }
  0x3a   : > { %2779 = vmatprep.subr.bf16.mxu0 %v3120_v2 }
  0x9b   : > { %v550_v13 = vpop.permute.xlu0 %549 }
  0x9c   : > { %vm551_vm1 = vcmp.eq.s32.totalorder %v3320_v12, %v550_v13 }
  0x9d   : > { %vm2520_vm2 = vmpackc.low %vm551_vm1, %vm551_vm1 }
  0x9e   : > { %2726 = vmatmul.mubr.msk.bf16.vlgmr.msra.gmra.mxu0 %vm2520_vm2, %v3122_v14 }
  0x9f   : > { %2781 = vmatprep.mubr.msk.bf16.mxu0 %vm3121_vm0, %v3120_v2 }
 0x15e   : > { %v654_v16 = vpop.f32.mrf.mxu0 }
 0x15f   : > { %v3328_v17 = vadd.f32 %v654_v16, %v571_v15 }
 0x160   : > { %v2727_v18 = vpop.f32.mrf.mxu0 }
 0x161   : > { %v667_v19 = vsel %vm666_vm3, %v3328_v17, 0.0 }
 0x162   : > { %668 = vadd.xlane.f32.xlu0 %v667_v19  ;;  %v657_v20 = vpop.f32.mrf.mxu0 }
 0x164   : > { %v2728_v21 = vpop.f32.mrf.mxu0 }
 0x1eb   : > { %v669_v22 = vpop.xlane.xlu0 %668 }
 0x1ec   : > { %v671_v23 = vmul.f32 0.03125, %v669_v22 }
 0x1ee   : > { %v672_v24 = vsub.f32 %v3328_v17, %v671_v23 }
 0x1f0   : > { %v673_v25 = vmul.f32 %v672_v24, %v672_v24 }
 0x1f2   : > { %v674_v26 = vsel %vm666_vm3, %v673_v25, 0.0 }
 0x1f3   : > { %675 = vadd.xlane.f32.xlu1 %v674_v26 }
 0x27c   : > { %v676_v29 = vpop.xlane.xlu1 %675 }
 0x27d   : > { %v677_v30 = vmul.f32 0.03125, %v676_v29 }
 0x27f   : > { %v678_v31 = vadd.f32 1e-05, %v677_v30 }
 0x281   : > { %3007 = vrsqrt.f32 %v678_v31 }
 0x28e   : > { %v3008_v32 = vpop.eup %3007 }
 0x28f   : > { %v680_v34 = vmul.f32 %v3008_v32, %v672_v24 }
 0x291   : > { %v687_v36 = vmul.f32 %v2522_v33, %v680_v34 }
 0x293   : > { %v694_v37 = vadd.f32 %v2523_v35, %v687_v36 }
 0x295   : > { %v695_v38 = vpack.c.bf16 %v694_v37, %v694_v37 }
 0x297   : > { %2734 = vmatmul.mubr.msk.bf16.vlgmr.msra.gmra.mxu1 %vm666_vm3, %v695_v38 }
 0x298   : > { %2739 = vmatprep.mubr.msk.bf16.mxu1 %vm3121_vm0, %v3120_v2 }
 0x357   : > { %v756_v40 = vpop.f32.mrf.mxu1 }
 0x358   : > { %v3354_v41 = vadd.f32 %v2524_v39, %v756_v40 }
 0x359   : > { %v2735_v42 = vpop.f32.mrf.mxu1 }
 0x35a   : > { %781 = vrot.lane.b32.xlu0 %v3354_v41, %s3781_s26  ;;  %772 = vrot.lane.b32.xlu1 %v3354_v41, %s3124_s24  ;;  %v796_v51 = vpack.c.bf16 %v3354_v41, %v3354_v41  ;;  %s3800_s26 = smov 80  }
 0x35b   : > { %v759_v43 = vpop.f32.mrf.mxu1 }
 0x35d   : > { %v2736_v44 = vpop.f32.mrf.mxu1 }
 0x35e   : > { %775 = vrot.lane.b32.xlu1 %v3354_v41, %s3125_s0 }
 0x362   : > { %763 = vrot.lane.b32.xlu1 %v3354_v41, %s3126_s19 }
 0x366   : > { %778 = vrot.lane.b32.xlu1 %v3354_v41, %s3782_s20  ;;  %s3807_s20 = smov 40  }
 0x36a   : > { %766 = vrot.lane.b32.xlu1 %v3354_v41, %s3777_s18  ;;  %s3780_s18 = smov 8  }
 0x36e   : > { %769 = vrot.lane.b32.xlu1 %v3354_v41, %s3776_s21  ;;  %s3802_s21 = smov 112  }
 0x3cc   : > { %v773_v45 = vpop.permute.xlu1 %772  ;;  %v782_v57 = vpop.permute.xlu0 %781 }
 0x3cd   : > { %v800_v46 = vpack.c.bf16 %v773_v45, %v773_v45  ;;  %v803_v59 = vpack.c.bf16 %v782_v57, %v782_v57 }
 0x3cf   : > { %v813_v47 = vsel %vm808_vm4, %v800_v46, 0  ;;  %v951_v61 = vsel %vm808_vm4, %v803_v59, 0 }
 0x3d0   : > { %2738 = vmatpush3.bf16.xpose.msra.mxu1 %v813_v47  ;;  %v776_v48 = vpop.permute.xlu1 %775 }
 0x3d1   : > { %2743 = vmatprep.subr.bf16.mxu1 %v3120_v2  ;;  %v801_v49 = vpack.c.bf16 %v776_v48, %v776_v48 }
 0x3d3   : > { %v859_v52 = vsel %vm808_vm4, %v801_v49, 0 }
 0x3d4   : > { %v764_v50 = vpop.permute.xlu1 %763 }
 0x3d5   : > { %v797_v55 = vpack.c.bf16 %v764_v50, %v764_v50 }
 0x3d7   : > { %2740 = vmatmul.mubr.msk.bf16.vlgmr.msra.gmra.mxu1 %vm808_vm4, %v796_v51 }
 0x3d8   : > { %v779_v53 = vpop.permute.xlu1 %778  ;;  %2744 = vmatpush3.bf16.xpose.msra.mxu1 %v859_v52  ;;  %2745 = vmatprep.mubr.msk.bf16.mxu1 %vm3121_vm0, %v3120_v2 }
 0x3d9   : > { %2749 = vmatprep.subr.bf16.mxu1 %v3120_v2  ;;  %v802_v54 = vpack.c.bf16 %v779_v53, %v779_v53 }
 0x3db   : > { %v905_v56 = vsel %vm808_vm4, %v802_v54, 0 }
 0x3dc   : > { %v767_v58 = vpop.permute.xlu1 %766 }
 0x3dd   : > { %v798_v60 = vpack.c.bf16 %v767_v58, %v767_v58 }
 0x3df   : > { %2746 = vmatmul.mubr.msk.bf16.vlgmr.msra.gmra.mxu1 %vm808_vm4, %v797_v55 }
 0x3e0   : > { %2750 = vmatpush3.bf16.xpose.msra.mxu1 %v905_v56  ;;  %2751 = vmatprep.mubr.msk.bf16.mxu1 %vm3121_vm0, %v3120_v2  ;;  %v770_v62 = vpop.permute.xlu1 %769 }
 0x3e1   : > { %2755 = vmatprep.subr.bf16.mxu1 %v3120_v2  ;;  %v799_v63 = vpack.c.bf16 %v770_v62, %v770_v62 }
 0x3e7   : > { %2752 = vmatmul.mubr.msk.bf16.vlgmr.msra.gmra.mxu1 %vm808_vm4, %v798_v60 }
 0x3e8   : > { %2756 = vmatpush3.bf16.xpose.msra.mxu1 %v951_v61  ;;  %2757 = vmatprep.mubr.msk.bf16.mxu1 %vm3121_vm0, %v3120_v2 }
 0x3e9   : > { %2761 = vmatprep.subr.bf16.mxu1 %v3120_v2 }
 0x3ef   : > { %2758 = vmatmul.mubr.msk.bf16.vlgmr.msra.gmra.mxu1 %vm808_vm4, %v799_v63 }
 0x3f0   : > { %2763 = vmatprep.mubr.msk.bf16.mxu1 %vm3121_vm0, %v3120_v2 }
 0x497   : > { %v849_v3 = vpop.f32.mrf.mxu1 }
 0x498   : > { %v850_v4 = vadd.f32 %v849_v3, %v3395_v1 }
 0x499   : > { %v2741_v5 = vpop.f32.mrf.mxu1 }
 0x49a   : > { %v993_v6 = vsel %vm808_vm4, %v850_v4, -inf }
 0x49b   : > { %994 = vmax.xlane.f32.xlu1 %v993_v6  ;;  %v852_v7 = vpop.f32.mrf.mxu1 }
 0x49d   : > { %v2742_v8 = vpop.f32.mrf.mxu1 }
 0x49f   : > { %v895_v9 = vpop.f32.mrf.mxu1 }
 0x4a0   : > { %v896_v10 = vadd.f32 %v895_v9, %v3395_v1 }
 0x4a1   : > { %v2747_v13 = vpop.f32.mrf.mxu1 }
 0x4a2   : > { %v996_v11 = vsel %vm808_vm4, %v896_v10, -inf }
 0x4a3   : > { %997 = vmax.xlane.f32.xlu0 %v996_v11  ;;  %v898_v12 = vpop.f32.mrf.mxu1 }
 0x4a5   : > { %v2748_v14 = vpop.f32.mrf.mxu1 }
 0x4a7   : > { %v941_v15 = vpop.f32.mrf.mxu1 }
 0x4a8   : > { %v942_v16 = vadd.f32 %v941_v15, %v3395_v1 }
 0x4a9   : > { %v2753_v18 = vpop.f32.mrf.mxu1 }
 0x4aa   : > { %v999_v19 = vsel %vm808_vm4, %v942_v16, -inf  ;;  %v2981_v18 = vld [vmem:[%s3755_s7 + $0x8] sm:$0xff]  }
 0x4ab   : > { %1000 = vmax.xlane.f32.xlu1 %v999_v19  ;;  %v944_v20 = vpop.f32.mrf.mxu1 }
 0x4ac   : > { %v2982_v20 = vld [vmem:[%s3755_s7] sm:$0xff]  }
 0x4ad   : > { %v2754_v21 = vpop.f32.mrf.mxu1 }
 0x4af   : > { %v987_v22 = vpop.f32.mrf.mxu1 }
 0x4b0   : > { %v988_v23 = vadd.f32 %v987_v22, %v3395_v1 }
 0x4b1   : > { %v2759_v24 = vpop.f32.mrf.mxu1 }
 0x4b2   : > { %v1002_v25 = vsel %vm808_vm4, %v988_v23, -inf }
 0x4b3   : > { %1003 = vmax.xlane.f32.xlu1 %v1002_v25  ;;  %v990_v26 = vpop.f32.mrf.mxu1 }
 0x4b5   : > { %v2760_v27 = vpop.f32.mrf.mxu1 }
 0x4c4   : > { %784 = vrot.lane.b32.xlu1 %v3354_v41, %s3772_s22  ;;  %s3774_s22 = smov 56  }
 0x524   : > { %v995_v28 = vpop.xlane.xlu1 %994 }
 0x525   : > { %v1005_v29 = vsub.f32 %v850_v4, %v995_v28 }
 0x527   : > { %v1009_v30 = vmul.f32 1.442695, %v1005_v29 }
 0x529   : > { %3009 = vpow2.f32 %v1009_v30 }
 0x52c   : > { %v998_v31 = vpop.xlane.xlu0 %997 }
 0x52d   : > { %v1006_v32 = vsub.f32 %v896_v10, %v998_v31 }
 0x52f   : > { %v1011_v33 = vmul.f32 1.442695, %v1006_v32 }
 0x531   : > { %3011 = vpow2.f32 %v1011_v33 }
 0x534   : > { %v1001_v34 = vpop.xlane.xlu1 %1000 }
 0x535   : > { %v1007_v35 = vsub.f32 %v942_v16, %v1001_v34 }
 0x536   : > { %v3010_v36 = vpop.eup %3009 }
 0x537   : > { %v1013_v37 = vmul.f32 1.442695, %v1007_v35  ;;  %v1017_v38 = vsel %vm808_vm4, %v3010_v36, 0.0 }
 0x538   : > { %1018 = vadd.xlane.f32.xlu1 %v1017_v38 }
 0x539   : > { %3013 = vpow2.f32 %v1013_v37 }
 0x53c   : > { %v1004_v39 = vpop.xlane.xlu1 %1003 }
 0x53d   : > { %v1008_v40 = vsub.f32 %v988_v23, %v1004_v39 }
 0x53e   : > { %v3012_v42 = vpop.eup %3011 }
 0x53f   : > { %v1015_v43 = vmul.f32 1.442695, %v1008_v40  ;;  %v1020_v44 = vsel %vm808_vm4, %v3012_v42, 0.0 }
 0x540   : > { %1021 = vadd.xlane.f32.xlu0 %v1020_v44  ;;  %v785_v45 = vpop.permute.xlu1 %784 }
 0x541   : > { %3015 = vpow2.f32 %v1015_v43  ;;  %v804_v46 = vpack.c.bf16 %v785_v45, %v785_v45 }
 0x543   : > { %v1046_v47 = vsel %vm1044_vm6, %v804_v46, 0 }
 0x544   : > { %2762 = vmatpush3.bf16.msra.mxu1 %v1046_v47 }
 0x545   : > { %2767 = vmatprep.subr.bf16.mxu1 %v3120_v2 }
 0x546   : > { %v3014_v48 = vpop.eup %3013 }
 0x547   : > { %v1023_v49 = vsel %vm808_vm4, %v3014_v48, 0.0 }
 0x548   : > { %1024 = vadd.xlane.f32.xlu1 %v1023_v49 }
 0x54e   : > { %v3016_v50 = vpop.eup %3015 }
 0x54f   : > { %v1026_v51 = vsel %vm808_vm4, %v3016_v50, 0.0 }
 0x550   : > { %1027 = vadd.xlane.f32.xlu0 %v1026_v51 }
 0x559   : > { %790 = vrot.lane.b32.xlu1 %v3354_v41, %s3775_s29  ;;  %s3803_s29 = smov 104  }
 0x55d   : > { %793 = vrot.lane.b32.xlu1 %v3354_v41, %s3773_s30  ;;  %s3779_s30 = smov 24  }
 0x566   : > { %787 = vrot.lane.b32.xlu0 %v3354_v41, %s3774_s22  ;;  %s3778_s22 = smov 16  }
 0x5c1   : > { %v1019_v52 = vpop.xlane.xlu1 %1018 }
 0x5c2   : > { %3017 = vrcp.f32 %v1019_v52 }
 0x5c9   : > { %v1022_v53 = vpop.xlane.xlu0 %1021 }
 0x5ca   : > { %3019 = vrcp.f32 %v1022_v53 }
 0x5cf   : > { %v3018_v54 = vpop.eup %3017 }
 0x5d0   : > { %v1033_v55 = vmul.f32 %v3018_v54, %v3010_v36  ;;  %v2984_v54 = vld [vmem:[%s3759_s11] sm:$0xff]  }
 0x5d1   : > { %v1025_v56 = vpop.xlane.xlu1 %1024 }
 0x5d2   : > { %v1037_v57 = vpack.c.bf16 %v1033_v55, %v1033_v55  ;;  %3021 = vrcp.f32 %v1025_v56 }
 0x5d4   : > { %2764 = vmatmul.mubr.msk.bf16.vlgmr.msra.gmra.mxu1 %vm808_vm4, %v1037_v57 }
 0x5d5   : > { %v791_v58 = vpop.permute.xlu1 %790  ;;  %2769 = vmatprep.mubr.msk.bf16.mxu1 %vm3121_vm0, %v3120_v2 }
 0x5d6   : > { %v806_v4 = vpack.c.bf16 %v791_v58, %v791_v58 }
 0x5d7   : > { %v3020_v41 = vpop.eup %3019 }
 0x5d8   : > { %v1034_v3 = vmul.f32 %v3020_v41, %v3012_v42  ;;  %v1138_v8 = vsel %vm1044_vm6, %v806_v4, 0  ;;  %v2539_v42 = vld [vmem:[%s3756_s8] ss:$0 sm:$0xff]  ;;  %v2987_v4 = vld [vmem:[%s3761_s13 + $0x28] sm:$0xff]  }
 0x5d9   : > { %v1028_v59 = vpop.xlane.xlu0 %1027  ;;  %v794_v60 = vpop.permute.xlu1 %793 }
 0x5da   : > { %3023 = vrcp.f32 %v1028_v59  ;;  %v807_v61 = vpack.c.bf16 %v794_v60, %v794_v60  ;;  %v1038_v6 = vpack.c.bf16 %v1034_v3, %v1034_v3  ;;  %v2540_v59 = vld [vmem:[%s3757_s9] ss:$0 sm:$0xff]  ;;  %v2986_v3 = vld [vmem:[%s3761_s13 + $0x30] sm:$0xff]  }
 0x5dc   : > { %v1184_v62 = vsel %vm1044_vm6, %v807_v61, 0  ;;  %v2541_v61 = vld [vmem:[%s3758_s10] ss:$0 sm:$0xff] }
 0x5dd   : > { %v788_v63 = vpop.permute.xlu0 %787  ;;  %2780 = vmatpush3.bf16.msra.mxu0 %v1184_v62 }
 0x5de   : > { %v805_v0 = vpack.c.bf16 %v788_v63, %v788_v63  ;;  %2793 = vmatprep.subr.bf16.mxu0 %v3120_v2 }
 0x5df   : > { %v3022_v7 = vpop.eup %3021 }
 0x5e0   : > { %v1092_v5 = vsel %vm1044_vm6, %v805_v0, 0  ;;  %v1035_v9 = vmul.f32 %v3022_v7, %v3014_v48  ;;  %v2985_v0 = vld [vmem:[%s3761_s13 + $0x38] sm:$0xff]   ;;  %v2990_v7 = vld [vmem:[%s3761_s13 + $0x10] sm:$0xff]  }
 0x5e1   : > { %2768 = vmatpush3.bf16.msra.mxu1 %v1092_v5  ;;  %v2988_v5 = vld [vmem:[%s3761_s13 + $0x20] sm:$0xff]  }
 0x5e2   : > { %2773 = vmatprep.subr.bf16.mxu1 %v3120_v2  ;;  %v1039_v11 = vpack.c.bf16 %v1035_v9, %v1035_v9  ;;  %v2992_v9 = vld [vmem:[%s3761_s13] sm:$0xff]  }
 0x5e4   : > { %2770 = vmatmul.mubr.msk.bf16.vlgmr.msra.gmra.mxu1 %vm808_vm4, %v1038_v6  ;;  %v2989_v6 = vld [vmem:[%s3761_s13 + $0x18] sm:$0xff]  }
 0x5e5   : > { %2774 = vmatpush3.bf16.msra.mxu1 %v1138_v8  ;;  %2775 = vmatprep.mubr.msk.bf16.mxu1 %vm3121_vm0, %v3120_v2  ;;  %v2991_v8 = vld [vmem:[%s3761_s13 + $0x8] sm:$0xff]  }
 0x5e6   : > { %2785 = vmatprep.subr.bf16.mxu1 %v3120_v2 }
 0x5e7   : > { %v3024_v10 = vpop.eup %3023 }
 0x5e8   : > { %v1036_v13 = vmul.f32 %v3024_v10, %v3016_v50  ;;  %v2542_v10 = vld [vmem:[%s3760_s12] ss:$0 sm:$0xff] }
 0x5ea   : > { %v1040_v12 = vpack.c.bf16 %v1036_v13, %v1036_v13 }
 0x5ec   : > { %2776 = vmatmul.mubr.msk.bf16.vlgmr.msra.gmra.mxu1 %vm808_vm4, %v1039_v11  ;;  %2782 = vmatmul.mubr.msk.bf16.vlgmr.msra.gmra.mxu0 %vm808_vm4, %v1040_v12 }
 0x5ed   : > { %2789 = vmatprep.mubr.msk.bf16.mxu1 %vm3121_vm0, %v3120_v2  ;;  %2797 = vmatprep.mubr.msk.bf16.mxu0 %vm3121_vm0, %v3120_v2 }
 0x5ee   : > { %2786 = vmatpush3.bf16.msra.mxu1 %v2981_v18 }
 0x5ef   : > { %2787 = vmatprep.subr.bf16.mxu1 %v3120_v2 }
 0x5f2   : > { %2788 = vmatpush3.bf16.msra.mxu1 %v2982_v20 }
 0x5f3   : > { %2801 = vmatprep.subr.bf16.mxu1 %v3120_v2 }
 0x694   : > { %v1082_v14 = vpop.f32.mrf.mxu1 }
 0x696   : > { %v2765_v15 = vpop.f32.mrf.mxu1 }
 0x698   : > { %v1085_v16 = vpop.f32.mrf.mxu1 }
 0x69a   : > { %v2766_v19 = vpop.f32.mrf.mxu1 }
 0x6a4   : > { %v1128_v21 = vpop.f32.mrf.mxu1 }
 0x6a5   : > { %1227 = vrot.lane.b32.xlu0 %v1128_v21, %s3780_s18  ;;  %s3801_s18 = smov 72  }
 0x6a6   : > { %v2771_v22 = vpop.f32.mrf.mxu1 }
 0x6a8   : > { %v1131_v23 = vpop.f32.mrf.mxu1 }
 0x6aa   : > { %v2772_v24 = vpop.f32.mrf.mxu1 }
 0x6ac   : > { %v1174_v25 = vpop.f32.mrf.mxu1  ;;  %v1220_v26 = vpop.f32.mrf.mxu0 }
 0x6ad   : > { %1231 = vrot.lane.b32.xlu1 %v1174_v25, %s3778_s22  ;;  %1235 = vrot.lane.b32.xlu0 %v1220_v26, %s3779_s30  ;;  %v2555_v25 = vld [vmem:[%s3762_s14] ss:$0 sm:$0xff]  ;;  %s3808_s22 = smov 8  }
 0x6ae   : > { %v2777_v27 = vpop.f32.mrf.mxu1  ;;  %v2783_v28 = vpop.f32.mrf.mxu0 }
 0x6b0   : > { %v1177_v29 = vpop.f32.mrf.mxu1  ;;  %v1223_v30 = vpop.f32.mrf.mxu0 }
 0x6b2   : > { %v2778_v31 = vpop.f32.mrf.mxu1  ;;  %v2784_v32 = vpop.f32.mrf.mxu0 }
 0x717   : > { %v1228_v33 = vpop.permute.xlu0 %1227 }
 0x718   : > { %v1238_v34 = vsel %vm808_vm4, %v1082_v14, %v1228_v33 }
 0x71f   : > { %v1232_v35 = vpop.permute.xlu1 %1231  ;;  %v1236_v36 = vpop.permute.xlu0 %1235 }
 0x720   : > { %v1240_v37 = vsel %vm1239_vm7, %v1238_v34, %v1232_v35 }
 0x721   : > { %v1242_v38 = vsel %vm1241_vm8, %v1240_v37, %v1236_v36  ;;  %v2993_v37 = vld [vmem:[%s3753_s5 + $0x18] sm:$0xff]  }
 0x722   : > { %v1243_v39 = vpack.c.bf16 %v1242_v38, %v1242_v38  ;;  %v2994_v38 = vld [vmem:[%s3753_s5 + $0x10] sm:$0xff]  }
 0x724   : > { %2790 = vmatmul.mubr.msk.bf16.vlgmr.msra.gmra.mxu1 %vm666_vm3, %v1243_v39 }
 0x725   : > { %2817 = vmatprep.mubr.msk.bf16.mxu1 %vm3121_vm0, %v3120_v2  ;;  %2802 = vmatpush3.bf16.msra.mxu1 %v2985_v0 }
 0x726   : > { %2803 = vmatprep.subr.bf16.mxu1 %v3120_v2 }
 0x729   : > { %2804 = vmatpush3.bf16.msra.mxu1 %v2986_v3 }
 0x72a   : > { %2805 = vmatprep.subr.bf16.mxu1 %v3120_v2 }
 0x72d   : > { %2806 = vmatpush3.bf16.msra.mxu1 %v2987_v4 }
 0x72e   : > { %2807 = vmatprep.subr.bf16.mxu1 %v3120_v2 }
 0x731   : > { %2808 = vmatpush3.bf16.msra.mxu1 %v2988_v5 }
 0x732   : > { %2809 = vmatprep.subr.bf16.mxu1 %v3120_v2 }
 0x735   : > { %2810 = vmatpush3.bf16.msra.mxu1 %v2989_v6 }
 0x736   : > { %2811 = vmatprep.subr.bf16.mxu1 %v3120_v2 }
 0x739   : > { %2812 = vmatpush3.bf16.msra.mxu1 %v2990_v7 }
 0x73a   : > { %2813 = vmatprep.subr.bf16.mxu1 %v3120_v2 }
 0x73d   : > { %2814 = vmatpush3.bf16.msra.mxu1 %v2991_v8 }
 0x73e   : > { %2815 = vmatprep.subr.bf16.mxu1 %v3120_v2 }
 0x741   : > { %2816 = vmatpush3.bf16.msra.mxu1 %v2992_v9 }
 0x742   : > { %2847 = vmatprep.subr.bf16.mxu1 %v3120_v2 }
 0x7e4   : > { %v1297_v40 = vpop.f32.mrf.mxu1 }
 0x7e5   : > { %v1303_v43 = vadd.f32 %v1297_v40, %v3328_v17  ;;  %v2983_v17 = vld [vmem:[%s3759_s11 + $0x8] sm:$0xff]  }
 0x7e6   : > { %v2791_v44 = vpop.f32.mrf.mxu1  ;;  %2794 = vmatpush3.bf16.msra.mxu0 %v2983_v17 }
 0x7e7   : > { %v3458_v45 = vadd.f32 %v2539_v42, %v1303_v43  ;;  %2795 = vmatprep.subr.bf16.mxu0 %v3120_v2  ;;  %v2558_v44 = vld [vmem:[%s3798_s3 + $0x1] ss:$0 sm:$0xff] }
 0x7e8   : > { %v1300_v46 = vpop.f32.mrf.mxu1 }
 0x7e9   : > { %v1314_v47 = vsel %vm666_vm3, %v3458_v45, 0.0  ;;  %v2559_v46 = vld [vmem:[%s3799_s4 + $0x1] ss:$0 sm:$0xff] }
 0x7ea   : > { %1315 = vadd.xlane.f32.xlu1 %v1314_v47  ;;  %v2792_v48 = vpop.f32.mrf.mxu1  ;;  %2796 = vmatpush3.bf16.msra.mxu0 %v2984_v54 }
 0x7eb   : > { %2821 = vmatprep.subr.bf16.mxu0 %v3120_v2 }
 0x873   : > { %v1316_v49 = vpop.xlane.xlu1 %1315 }
 0x874   : > { %v1317_v50 = vmul.f32 0.03125, %v1316_v49 }
 0x876   : > { %v1318_v51 = vsub.f32 %v3458_v45, %v1317_v50  ;;  %v2565_v50 = vld [vmem:[%s3754_s6 + $0x1] ss:$0 sm:$0xff] }
 0x878   : > { %v1319_v52 = vmul.f32 %v1318_v51, %v1318_v51 }
 0x87a   : > { %v1320_v53 = vsel %vm666_vm3, %v1319_v52, 0.0 }
 0x87b   : > { %1321 = vadd.xlane.f32.xlu0 %v1320_v53 }
 0x904   : > { %v1322_v55 = vpop.xlane.xlu0 %1321 }
 0x905   : > { %v1323_v56 = vmul.f32 0.03125, %v1322_v55 }
 0x907   : > { %v1324_v57 = vadd.f32 1e-05, %v1323_v56 }
 0x909   : > { %3025 = vrsqrt.f32 %v1324_v57 }
 0x916   : > { %v3026_v58 = vpop.eup %3025 }
 0x917   : > { %v1326_v60 = vmul.f32 %v3026_v58, %v1318_v51 }
 0x919   : > { %v1333_v41 = vmul.f32 %v2540_v59, %v1326_v60 }
 0x91b   : > { %v1340_v62 = vadd.f32 %v2541_v61, %v1333_v41 }
 0x91d   : > { %v1341_v63 = vpack.c.bf16 %v1340_v62, %v1340_v62 }
 0x91f   : > { %2798 = vmatmul.mubr.msk.bf16.vlgmr.msra.gmra.mxu0 %vm666_vm3, %v1341_v63 }
 0x920   : > { %2825 = vmatprep.mubr.msk.bf16.mxu0 %vm3121_vm0, %v3120_v2  ;;  %2822 = vmatpush3.bf16.msra.mxu0 %v2993_v37 }
 0x921   : > { %2823 = vmatprep.subr.bf16.mxu0 %v3120_v2 }
 0x924   : > { %2824 = vmatpush3.bf16.msra.mxu0 %v2994_v38 }
 0x925   : > { %2829 = vmatprep.subr.bf16.mxu0 %v3120_v2 }
 0x9df   : > { %v1402_v13 = vpop.f32.mrf.mxu0 }
 0x9e0   : > { %v1403_v11 = vadd.f32 %v2542_v10, %v1402_v13 }
 0x9e1   : > { %v2799_v12 = vpop.f32.mrf.mxu0 }
 0x9e2   : > { %v2546_v14 = vmul.f32 -1.702, %v1403_v11 }
 0x9e3   : > { %v1405_v15 = vpop.f32.mrf.mxu0 }
 0x9e4   : > { %v1410_v16 = vmul.f32 1.442695, %v2546_v14 }
 0x9e5   : > { %v2800_v18 = vpop.f32.mrf.mxu0 }
 0x9e6   : > { %3027 = vpow2.f32 %v1410_v16 }
 0x9f3   : > { %v3028_v19 = vpop.eup %3027 }
 0x9f4   : > { %v1412_v20 = vadd.f32 1.0, %v3028_v19 }
 0x9f6   : > { %3029 = vrcp.f32 %v1412_v20 }
 0xa03   : > { %v3030_v21 = vpop.eup %3029 }
 0xa04   : > { %v1415_v22 = vmul.f32 %v3030_v21, %v1403_v11 }
 0xa06   : > { %v1416_v23 = vpack.c.bf16 %v1415_v22, %v1415_v22 }
 0xa08   : > { %2818 = vmatmul.mubr.bf16.vlgmr.msra.gmra.mxu1 %v1416_v23 }
 0xa09   : > { %2849 = vmatprep.mubr.msk.bf16.mxu1 %vm3121_vm0, %v3120_v2 }
 0xac8   : > { %v1515_v24 = vpop.f32.mrf.mxu1 }
 0xac9   : > { %v1521_v26 = vadd.f32 %v1515_v24, %v3458_v45 }
 0xaca   : > { %v2819_v27 = vpop.f32.mrf.mxu1 }
 0xacb   : > { %v3522_v28 = vadd.f32 %v2555_v25, %v1521_v26 }
 0xacc   : > { %v1518_v29 = vpop.f32.mrf.mxu1 }
 0xacd   : > { %v1534_v30 = vsel %vm666_vm3, %v3522_v28, 0.0 }
 0xace   : > { %1535 = vadd.xlane.f32.xlu0 %v1534_v30  ;;  %v2820_v31 = vpop.f32.mrf.mxu1 }
 0xb57   : > { %v1536_v32 = vpop.xlane.xlu0 %1535 }
 0xb58   : > { %v1537_v33 = vmul.f32 0.03125, %v1536_v32 }
 0xb5a   : > { %v1538_v34 = vsub.f32 %v3522_v28, %v1537_v33 }
 0xb5c   : > { %v1539_v35 = vmul.f32 %v1538_v34, %v1538_v34 }
 0xb5e   : > { %v1540_v36 = vsel %vm666_vm3, %v1539_v35, 0.0 }
 0xb5f   : > { %1541 = vadd.xlane.f32.xlu1 %v1540_v36 }
 0xbe8   : > { %v1542_v39 = vpop.xlane.xlu1 %1541 }
 0xbe9   : > { %v1543_v40 = vmul.f32 0.03125, %v1542_v39 }
 0xbeb   : > { %v1544_v42 = vadd.f32 1e-05, %v1543_v40 }
 0xbed   : > { %3031 = vrsqrt.f32 %v1544_v42 }
 0xbfa   : > { %v3032_v43 = vpop.eup %3031 }
 0xbfb   : > { %v1546_v45 = vmul.f32 %v3032_v43, %v1538_v34 }
 0xbfd   : > { %v1553_v47 = vmul.f32 %v2558_v44, %v1546_v45 }
 0xbff   : > { %v1560_v48 = vadd.f32 %v2559_v46, %v1553_v47 }
 0xc01   : > { %v1561_v49 = vpack.c.bf16 %v1560_v48, %v1560_v48 }
 0xc03   : > { %2826 = vmatmul.mubr.msk.bf16.vlgmr.msra.gmra.mxu0 %vm666_vm3, %v1561_v49 }
 0xc04   : > { %2831 = vmatprep.mubr.msk.bf16.mxu0 %vm3121_vm0, %v3120_v2 }
 0xcc3   : > { %v1624_v51 = vpop.f32.mrf.mxu0 }
 0xcc4   : > { %v3548_v52 = vadd.f32 %v2565_v50, %v1624_v51 }
 0xcc5   : > { %v2827_v53 = vpop.f32.mrf.mxu0 }
 0xcc6   : > { %1643 = vrot.lane.b32.xlu1 %v3548_v52, %s3125_s0  ;;  %1640 = vrot.lane.b32.xlu0 %v3548_v52, %s3124_s24  ;;  %v1664_v62 = vpack.c.bf16 %v3548_v52, %v3548_v52  ;;  %s3804_s24 = smov 64   ;;  %s3805_s0 = smov 48  }
 0xcc7   : > { %v1627_v17 = vpop.f32.mrf.mxu0 }
 0xcc9   : > { %v2828_v54 = vpop.f32.mrf.mxu0 }
 0xcca   : > { %1631 = vrot.lane.b32.xlu1 %v3548_v52, %s3126_s19  ;;  %1646 = vrot.lane.b32.xlu0 %v3548_v52, %s3800_s26  ;;  %s3806_s19 = smov 56  }
 0xcce   : > { %1649 = vrot.lane.b32.xlu1 %v3548_v52, %s3801_s18  ;;  %1634 = vrot.lane.b32.xlu0 %v3548_v52, %s3802_s21  ;;  %s2629_s18 = sshll.u32 %s3249_s28, 7 }
 0xccf   : > { %s2444_s3 = scalar_lea.hbm %s3765_s17, %s2629_s18 }
 0xcd2   : > { %1637 = vrot.lane.b32.xlu1 %v3548_v52, %s3803_s29  ;;  %s3809_s29 = smov 24  }
 0xd38   : > { %v1644_v55 = vpop.permute.xlu1 %1643  ;;  %v1641_v56 = vpop.permute.xlu0 %1640 }
 0xd39   : > { %v1668_v57 = vpack.c.bf16 %v1641_v56, %v1641_v56  ;;  %v1669_v60 = vpack.c.bf16 %v1644_v55, %v1644_v55 }
 0xd3b   : > { %v1680_v58 = vsel %vm808_vm4, %v1668_v57, 0  ;;  %v1726_v63 = vsel %vm808_vm4, %v1669_v60, 0 }
 0xd3c   : > { %v1632_v59 = vpop.permute.xlu1 %1631  ;;  %2830 = vmatpush3.bf16.xpose.msra.mxu0 %v1680_v58  ;;  %v1647_v3 = vpop.permute.xlu0 %1646 }
 0xd3d   : > { %2835 = vmatprep.subr.bf16.mxu0 %v3120_v2  ;;  %v1670_v5 = vpack.c.bf16 %v1647_v3, %v1647_v3  ;;  %v1665_v6 = vpack.c.bf16 %v1632_v59, %v1632_v59 }
 0xd3f   : > { %v1772_v8 = vsel %vm808_vm4, %v1670_v5, 0 }
 0xd40   : > { %v1650_v61 = vpop.permute.xlu1 %1649  ;;  %v1635_v9 = vpop.permute.xlu0 %1634 }
 0xd41   : > { %v1671_v41 = vpack.c.bf16 %v1650_v61, %v1650_v61  ;;  %v1666_v10 = vpack.c.bf16 %v1635_v9, %v1635_v9 }
 0xd43   : > { %v1818_v0 = vsel %vm808_vm4, %v1671_v41, 0  ;;  %2832 = vmatmul.mubr.msk.bf16.vlgmr.msra.gmra.mxu0 %vm808_vm4, %v1664_v62 }
 0xd44   : > { %2848 = vmatpush3.bf16.xpose.msra.mxu1 %v1818_v0  ;;  %2836 = vmatpush3.bf16.xpose.msra.mxu0 %v1726_v63  ;;  %v1638_v4 = vpop.permute.xlu1 %1637 }
 0xd45   : > { %2837 = vmatprep.mubr.msk.bf16.mxu0 %vm3121_vm0, %v3120_v2  ;;  %2841 = vmatprep.subr.bf16.mxu0 %v3120_v2  ;;  %v1667_v7 = vpack.c.bf16 %v1638_v4, %v1638_v4 }
 0xd46   : > { %2859 = vmatprep.subr.bf16.mxu1 %v3120_v2 }
 0xd4b   : > { %2838 = vmatmul.mubr.msk.bf16.vlgmr.msra.gmra.mxu0 %vm808_vm4, %v1665_v6  ;;  %2850 = vmatmul.mubr.msk.bf16.vlgmr.msra.gmra.mxu1 %vm808_vm4, %v1667_v7 }
 0xd4c   : > { %2842 = vmatpush3.bf16.xpose.msra.mxu0 %v1772_v8  ;;  %2843 = vmatprep.mubr.msk.bf16.mxu0 %vm3121_vm0, %v3120_v2 }
 0xd4d   : > { %2853 = vmatprep.subr.bf16.mxu0 %v3120_v2  ;;  %2861 = vmatprep.mubr.msk.bf16.mxu1 %vm3121_vm0, %v3120_v2 }
 0xd53   : > { %2844 = vmatmul.mubr.msk.bf16.vlgmr.msra.gmra.mxu0 %vm808_vm4, %v1666_v10 }
 0xd54   : > { %2855 = vmatprep.mubr.msk.bf16.mxu0 %vm3121_vm0, %v3120_v2 }
 0xe03   : > { %v1716_v13 = vpop.f32.mrf.mxu0 }
 0xe04   : > { %v1717_v11 = vadd.f32 %v1716_v13, %v3395_v1 }
 0xe05   : > { %v2833_v12 = vpop.f32.mrf.mxu0 }
 0xe06   : > { %v1860_v14 = vsel %vm808_vm4, %v1717_v11, -inf }
 0xe07   : > { %1861 = vmax.xlane.f32.xlu0 %v1860_v14  ;;  %v1719_v15 = vpop.f32.mrf.mxu0 }
 0xe09   : > { %v2834_v16 = vpop.f32.mrf.mxu0 }
 0xe0b   : > { %v1762_v18 = vpop.f32.mrf.mxu0  ;;  %v1854_v19 = vpop.f32.mrf.mxu1 }
 0xe0c   : > { %v1763_v20 = vadd.f32 %v1762_v18, %v3395_v1  ;;  %v1855_v32 = vadd.f32 %v1854_v19, %v3395_v1 }
 0xe0d   : > { %v2839_v21 = vpop.f32.mrf.mxu0  ;;  %v2851_v22 = vpop.f32.mrf.mxu1 }
 0xe0e   : > { %v1863_v23 = vsel %vm808_vm4, %v1763_v20, -inf  ;;  %v1869_v36 = vsel %vm808_vm4, %v1855_v32, -inf }
 0xe0f   : > { %v1857_v24 = vpop.f32.mrf.mxu1  ;;  %1864 = vmax.xlane.f32.xlu1 %v1863_v23  ;;  %v1765_v25 = vpop.f32.mrf.mxu0 }
 0xe11   : > { %v2840_v26 = vpop.f32.mrf.mxu0  ;;  %v2852_v27 = vpop.f32.mrf.mxu1 }
 0xe13   : > { %v1808_v29 = vpop.f32.mrf.mxu0 }
 0xe14   : > { %v1809_v30 = vadd.f32 %v1808_v29, %v3395_v1 }
 0xe15   : > { %v2845_v31 = vpop.f32.mrf.mxu0 }
 0xe16   : > { %v1866_v33 = vsel %vm808_vm4, %v1809_v30, -inf  ;;  %v2995_v31 = vld [vmem:[%s3755_s7 + $0x18] sm:$0xff]  }
 0xe17   : > { %1867 = vmax.xlane.f32.xlu0 %v1866_v33  ;;  %v1811_v34 = vpop.f32.mrf.mxu0 }
 0xe19   : > { %v2846_v35 = vpop.f32.mrf.mxu0 }
 0xe1b   : > { %1870 = vmax.xlane.f32.xlu0 %v1869_v36 }
 0xe20   : > { %1652 = vrot.lane.b32.xlu1 %v3548_v52, %s3804_s24  ;;  %s3810_s24 = smov 16  }
 0xe90   : > { %v1862_v37 = vpop.xlane.xlu0 %1861 }
 0xe91   : > { %v1872_v38 = vsub.f32 %v1717_v11, %v1862_v37 }
 0xe93   : > { %v1876_v39 = vmul.f32 1.442695, %v1872_v38 }
 0xe95   : > { %3033 = vpow2.f32 %v1876_v39 }
 0xe98   : > { %v1865_v40 = vpop.xlane.xlu1 %1864 }
 0xe99   : > { %v1873_v46 = vsub.f32 %v1763_v20, %v1865_v40 }
 0xe9b   : > { %v1878_v50 = vmul.f32 1.442695, %v1873_v46 }
 0xe9c   : > { %v1653_v42 = vpop.permute.xlu1 %1652 }
 0xe9d   : > { %v1672_v43 = vpack.c.bf16 %v1653_v42, %v1653_v42 }
 0xe9f   : > { %v1912_v1 = vsel %vm1044_vm6, %v1672_v43, 0 }
 0xea0   : > { %2854 = vmatpush3.bf16.msra.mxu0 %v1912_v1  ;;  %v1868_v44 = vpop.xlane.xlu0 %1867 }
 0xea1   : > { %2865 = vmatprep.subr.bf16.mxu0 %v3120_v2  ;;  %v1874_v56 = vsub.f32 %v1809_v30, %v1868_v44 }
 0xea2   : > { %v3034_v45 = vpop.eup %3033 }
 0xea3   : > { %v1884_v47 = vsel %vm808_vm4, %v3034_v45, 0.0  ;;  %v1880_v57 = vmul.f32 1.442695, %v1874_v56 }
 0xea4   : > { %1885 = vadd.xlane.f32.xlu1 %v1884_v47  ;;  %v1871_v48 = vpop.xlane.xlu0 %1870 }
 0xea5   : > { %v1875_v49 = vsub.f32 %v1855_v32, %v1871_v48  ;;  %v2996_v32 = vld [vmem:[%s3755_s7 + $0x10] sm:$0xff]  }
 0xea7   : > { %v1882_v51 = vmul.f32 1.442695, %v1875_v49  ;;  %v2585_v49 = vld [vmem:[%s3756_s8 + $0x1] ss:$0 sm:$0xff] }
 0xea9   : > { %3035 = vpow2.f32 %v1882_v51 }
 0xeaa   : > { %3037 = vpow2.f32 %v1878_v50 }
 0xeab   : > { %3039 = vpow2.f32 %v1880_v57 }
 0xeb5   : > { %1658 = vrot.lane.b32.xlu1 %v3548_v52, %s3805_s0  ;;  %s537_s0 = sand.u32 1, %s3109_s25  }
 0xeb6   : > { %v3036_v53 = vpop.eup %3035  ;;  %s2433_s4 = scalar_lea.sflag [#allocation3], %s537_s0 }
 0xeb7   : > { %v1893_v17 = vsel %vm808_vm4, %v3036_v53, 0.0  ;;  %v3038_v54 = vpop.eup %3037 }
 0xeb8   : > { %1894 = vadd.xlane.f32.xlu0 %v1893_v17  ;;  %v1887_v55 = vsel %vm808_vm4, %v3038_v54, 0.0  ;;  %v3040_v58 = vpop.eup %3039 }
 0xeb9   : > { %v1890_v59 = vsel %vm808_vm4, %v3040_v58, 0.0 }
 0xebc   : > { %1888 = vadd.xlane.f32.xlu0 %v1887_v55 }
 0xed2   : > { %1655 = vrot.lane.b32.xlu0 %v3548_v52, %s3806_s19  ;;  %s2509_s19 = sshll.u32 %s537_s0, 3 }
 0xed3   : > { %s539_s21 = scalar_lea.vmem [#allocation2], %s2509_s19 }
 0xed9   : > { %1891 = vadd.xlane.f32.xlu1 %v1890_v59 }
 0xeea   : > { %1661 = vrot.lane.b32.xlu1 %v3548_v52, %s3807_s20 }
 0xf2d   : > { %v1886_v60 = vpop.xlane.xlu1 %1885 }
 0xf2e   : > { %3041 = vrcp.f32 %v1886_v60 }
 0xf31   : > { %v1659_v61 = vpop.permute.xlu1 %1658 }
 0xf32   : > { %v1674_v62 = vpack.c.bf16 %v1659_v61, %v1659_v61  ;;  %v2998_v61 = vld [vmem:[%s3759_s11 + $0x10] sm:$0xff]  }
 0xf34   : > { %v2004_v3 = vsel %vm1044_vm6, %v1674_v62, 0 }
 0xf3b   : > { %v3042_v41 = vpop.eup %3041 }
 0xf3c   : > { %v1900_v63 = vmul.f32 %v3042_v41, %v3034_v45 }
 0xf3e   : > { %v1904_v0 = vpack.c.bf16 %v1900_v63, %v1900_v63 }
 0xf40   : > { %2856 = vmatmul.mubr.msk.bf16.vlgmr.msra.gmra.mxu0 %vm808_vm4, %v1904_v0 }
 0xf41   : > { %2866 = vmatpush3.bf16.msra.mxu0 %v2004_v3  ;;  %v1895_v4 = vpop.xlane.xlu0 %1894  ;;  %2867 = vmatprep.mubr.msk.bf16.mxu0 %vm3121_vm0, %v3120_v2  ;;  %v2588_v3 = vld [vmem:[%s3757_s9 + $0x1] ss:$0 sm:$0xff] }
 0xf42   : > { %2877 = vmatprep.subr.bf16.mxu0 %v3120_v2 }
 0xf45   : > { %v1889_v5 = vpop.xlane.xlu0 %1888 }
 0xf46   : > { %3043 = vrcp.f32 %v1889_v5  ;;  %v2589_v5 = vld [vmem:[%s3758_s10 + $0x1] ss:$0 sm:$0xff] }
 0xf47   : > { %3045 = vrcp.f32 %v1895_v4 }
 0xf49   : > { %v1656_v52 = vpop.permute.xlu0 %1655 }
 0xf4a   : > { %v1673_v6 = vpack.c.bf16 %v1656_v52, %v1656_v52 }
 0xf4c   : > { %v1958_v7 = vsel %vm1044_vm6, %v1673_v6, 0 }
 0xf4d   : > { %2860 = vmatpush3.bf16.msra.mxu1 %v1958_v7 }
 0xf4e   : > { %2871 = vmatprep.subr.bf16.mxu1 %v3120_v2 }
 0xf53   : > { %v3044_v8 = vpop.eup %3043 }
 0xf54   : > { %v1901_v9 = vmul.f32 %v3044_v8, %v3038_v54  ;;  %v3046_v11 = vpop.eup %3045  ;;  %v2999_v8 = vld [vmem:[%s3761_s13 + $0x78] sm:$0xff]  }
 0xf55   : > { %v1903_v15 = vmul.f32 %v3046_v11, %v3036_v53  ;;  %v3003_v11 = vld [vmem:[%s3761_s13 + $0x58] sm:$0xff]  }
 0xf56   : > { %v1905_v10 = vpack.c.bf16 %v1901_v9, %v1901_v9  ;;  %v3000_v9 = vld [vmem:[%s3761_s13 + $0x70] sm:$0xff]  }
 0xf57   : > { %v1907_v18 = vpack.c.bf16 %v1903_v15, %v1903_v15  ;;  %v3006_v15 = vld [vmem:[%s3761_s13 + $0x40] sm:$0xff]  }
 0xf58   : > { %2862 = vmatmul.mubr.msk.bf16.vlgmr.msra.gmra.mxu1 %vm808_vm4, %v1905_v10  ;;  %v3001_v10 = vld [vmem:[%s3761_s13 + $0x68] sm:$0xff]  }
 0xf59   : > { %2873 = vmatprep.mubr.msk.bf16.mxu1 %vm3121_vm0, %v3120_v2 }
 0xf62   : > { %v1892_v13 = vpop.xlane.xlu1 %1891 }
 0xf63   : > { %3047 = vrcp.f32 %v1892_v13  ;;  %v3002_v13 = vld [vmem:[%s3761_s13 + $0x60] sm:$0xff]  }
 0xf66   : > { %v1662_v12 = vpop.permute.xlu1 %1661 }
 0xf67   : > { %v1675_v14 = vpack.c.bf16 %v1662_v12, %v1662_v12  ;;  %v3004_v12 = vld [vmem:[%s3761_s13 + $0x50] sm:$0xff]  }
 0xf69   : > { %v2050_v16 = vsel %vm1044_vm6, %v1675_v14, 0  ;;  %v3005_v14 = vld [vmem:[%s3761_s13 + $0x48] sm:$0xff]  }
 0xf6a   : > { %2872 = vmatpush3.bf16.msra.mxu1 %v2050_v16  ;;  %v2595_v16 = vld [vmem:[%s3760_s12 + $0x1] ss:$0 sm:$0xff] }
 0xf6b   : > { %2885 = vmatprep.subr.bf16.mxu1 %v3120_v2 }
 0xf6d   : > { %2874 = vmatmul.mubr.msk.bf16.vlgmr.msra.gmra.mxu1 %vm808_vm4, %v1907_v18 }
 0xf6e   : > { %2889 = vmatprep.mubr.msk.bf16.mxu1 %vm3121_vm0, %v3120_v2 }
 0xf70   : > { %v3048_v19 = vpop.eup %3047 }
 0xf71   : > { %v1902_v20 = vmul.f32 %v3048_v19, %v3040_v58 }
 0xf73   : > { %v1906_v21 = vpack.c.bf16 %v1902_v20, %v1902_v20 }
 0xf75   : > { %2868 = vmatmul.mubr.msk.bf16.vlgmr.msra.gmra.mxu0 %vm808_vm4, %v1906_v21 }
 0xf76   : > { %2881 = vmatprep.mubr.msk.bf16.mxu0 %vm3121_vm0, %v3120_v2  ;;  %2878 = vmatpush3.bf16.msra.mxu0 %v2995_v31  ;;  %v2625_v31 = vld [vmem:[%s3762_s14 + $0x1] ss:$0 sm:$0xff] }
 0xf77   : > { %2879 = vmatprep.subr.bf16.mxu0 %v3120_v2 }
 0xf7a   : > { %2880 = vmatpush3.bf16.msra.mxu0 %v2996_v32 }
 0xf7b   : > { %2893 = vmatprep.subr.bf16.mxu0 %v3120_v2 }
0x1000   : > { %v1948_v22 = vpop.f32.mrf.mxu0 }
0x1002   : > { %v2857_v23 = vpop.f32.mrf.mxu0 }
0x1004   : > { %v1951_v24 = vpop.f32.mrf.mxu0 }
0x1006   : > { %v2858_v25 = vpop.f32.mrf.mxu0 }
0x1018   : > { %v1994_v26 = vpop.f32.mrf.mxu1 }
0x1019   : > { %2093 = vrot.lane.b32.xlu0 %v1994_v26, %s3808_s22  ;;  %s3137_s22 = smov [#allocation2]  }
0x101a   : > { %v2863_v27 = vpop.f32.mrf.mxu1  ;;  %s3061_s30 = sshll.u32 %s3137_s22, 4  ;;  %s3062_s30 = int_to_ptr.vmem [resolvable:$false] %s3061_s30 }
0x101b   : > { %s3063_s28 = scalar_lea.vmem %s3062_s30, 256 }
0x101c   : > { %v1997_v29 = vpop.f32.mrf.mxu1 }
0x101e   : > { %v2864_v30 = vpop.f32.mrf.mxu1 }
0x102d   : > { %v2086_v33 = vpop.f32.mrf.mxu1 }
0x102e   : > { %2101 = vrot.lane.b32.xlu0 %v2086_v33, %s3809_s29  ;;  %s2446_s29 = sshll.u32 %s539_s21, 4  ;;  %s2447_s29 = int_to_ptr.vmem [resolvable:$true] %s2446_s29 }
0x102f   : > { %v2875_v34 = vpop.f32.mrf.mxu1  ;;  %s3057_s20 = scalar_lea.vmem %s2447_s29, 128  ;;  %p3064_p0 = scmp.lt.s32.totalorder %s2447_s29, %s3062_s30 }
0x1030   : > { %p3058_p11 = scmp.ne.s32.totalorder %s2447_s29, %s3057_s20  ;;  %p3065_p1 = scmp.lt.s32.totalorder %s3063_s28, %s3057_s20 }
0x1031   : > { %v2089_v35 = vpop.f32.mrf.mxu1 }
0x1032   : > { %p3059_p12 = pnand %p3058_p11, %p3266_p5  ;;  %p3066_p2 = por %p3065_p1, %p3064_p0 }
0x1033   : > { %v2876_v36 = vpop.f32.mrf.mxu1 }
0x1034   : > { %p3060_p13 = pneg %p3059_p12 }
0x1035   : > { %v2040_v37 = vpop.f32.mrf.mxu0 }
0x1036   : > { %2097 = vrot.lane.b32.xlu1 %v2040_v37, %s3810_s24  ;;  %p3067_p3 = pnand %p3066_p2, %p3060_p13 }
0x1037   : > { %v2869_v38 = vpop.f32.mrf.mxu0 }
0x1039   : > { %v2043_v39 = vpop.f32.mrf.mxu0 }
0x103b   : > { %v2870_v40 = vpop.f32.mrf.mxu0 }
0x108b   : > { %v2094_v42 = vpop.permute.xlu0 %2093 }
0x108c   : > { %v2104_v43 = vsel %vm808_vm4, %v1948_v22, %v2094_v42 }
0x10a0   : > { %v2102_v44 = vpop.permute.xlu0 %2101 }
0x10a8   : > { %v2098_v1 = vpop.permute.xlu1 %2097 }
0x10a9   : > { %v2105_v45 = vsel %vm1239_vm7, %v2104_v43, %v2098_v1 }
0x10aa   : > { %v2106_v46 = vsel %vm1241_vm8, %v2105_v45, %v2102_v44 }
0x10ab   : > { %v2107_v47 = vpack.c.bf16 %v2106_v46, %v2106_v46 }
0x10ad   : > { %2882 = vmatmul.mubr.msk.bf16.vlgmr.msra.gmra.mxu0 %vm666_vm3, %v2107_v47  ;;  %v2626_v47 = vld [vmem:[%s3763_s15] ss:$0 sm:$0xff] }
0x10ae   : > { %2909 = vmatprep.mubr.msk.bf16.mxu0 %vm3121_vm0, %v3120_v2  ;;  %2894 = vmatpush3.bf16.msra.mxu0 %v2999_v8 }
0x10af   : > { %2895 = vmatprep.subr.bf16.mxu0 %v3120_v2 }
0x10b2   : > { %2896 = vmatpush3.bf16.msra.mxu0 %v3000_v9 }
0x10b3   : > { %2897 = vmatprep.subr.bf16.mxu0 %v3120_v2 }
0x10b6   : > { %2898 = vmatpush3.bf16.msra.mxu0 %v3001_v10 }
0x10b7   : > { %2899 = vmatprep.subr.bf16.mxu0 %v3120_v2 }
0x10ba   : > { %2900 = vmatpush3.bf16.msra.mxu0 %v3002_v13 }
0x10bb   : > { %2901 = vmatprep.subr.bf16.mxu0 %v3120_v2 }
0x10be   : > { %2902 = vmatpush3.bf16.msra.mxu0 %v3003_v11 }
0x10bf   : > { %2903 = vmatprep.subr.bf16.mxu0 %v3120_v2 }
0x10c2   : > { %2904 = vmatpush3.bf16.msra.mxu0 %v3004_v12 }
0x10c3   : > { %2905 = vmatprep.subr.bf16.mxu0 %v3120_v2 }
0x10c6   : > { %2906 = vmatpush3.bf16.msra.mxu0 %v3005_v14 }
0x10c7   : > { %2907 = vmatprep.subr.bf16.mxu0 %v3120_v2 }
0x10ca   : > { %2908 = vmatpush3.bf16.msra.mxu0 %v3006_v15 }
0x116d   : > { %v2162_v48 = vpop.f32.mrf.mxu0 }
0x116e   : > { %v2168_v50 = vadd.f32 %v2162_v48, %v3522_v28  ;;  %v2997_v28 = vld [vmem:[%s3759_s11 + $0x18] sm:$0xff]  }
0x116f   : > { %v2883_v51 = vpop.f32.mrf.mxu0  ;;  %2886 = vmatpush3.bf16.msra.mxu1 %v2997_v28 }
0x1170   : > { %v3647_v53 = vadd.f32 %v2585_v49, %v2168_v50  ;;  %2887 = vmatprep.subr.bf16.mxu1 %v3120_v2  ;;  %v2627_v49 = vld [vmem:[%s3764_s16] ss:$0 sm:$0xff] }
0x1171   : > { %v2165_v17 = vpop.f32.mrf.mxu0 }
0x1172   : > { %v2182_v54 = vsel %vm666_vm3, %v3647_v53, 0.0 }
0x1173   : > { %2183 = vadd.xlane.f32.xlu1 %v2182_v54  ;;  %v2884_v55 = vpop.f32.mrf.mxu0  ;;  %2888 = vmatpush3.bf16.msra.mxu1 %v2998_v61 }
0x11fc   : > { %v2184_v56 = vpop.xlane.xlu1 %2183 }
0x11fd   : > { %v2185_v57 = vmul.f32 0.03125, %v2184_v56 }
0x11ff   : > { %v2186_v58 = vsub.f32 %v3647_v53, %v2185_v57 }
0x1201   : > { %v2187_v59 = vmul.f32 %v2186_v58, %v2186_v58 }
0x1203   : > { %v2188_v60 = vsel %vm666_vm3, %v2187_v59, 0.0 }
0x1204   : > { %2189 = vadd.xlane.f32.xlu0 %v2188_v60 }
0x128d   : > { %v2190_v41 = vpop.xlane.xlu0 %2189 }
0x128e   : > { %v2191_v62 = vmul.f32 0.03125, %v2190_v41 }
0x1290   : > { %v2192_v63 = vadd.f32 1e-05, %v2191_v62 }
0x1292   : > { %3049 = vrsqrt.f32 %v2192_v63 }
0x129f   : > { %v3050_v0 = vpop.eup %3049 }
0x12a0   : > { %v2194_v4 = vmul.f32 %v3050_v0, %v2186_v58 }
0x12a2   : > { %v2201_v52 = vmul.f32 %v2588_v3, %v2194_v4 }
0x12a4   : > { %v2208_v6 = vadd.f32 %v2589_v5, %v2201_v52 }
0x12a6   : > { %v2209_v7 = vpack.c.bf16 %v2208_v6, %v2208_v6 }
0x12a8   : > { %2890 = vmatmul.mubr.msk.bf16.vlgmr.msra.gmra.mxu1 %vm666_vm3, %v2209_v7 }
0x1368   : > { %v2272_v18 = vpop.f32.mrf.mxu1 }
0x1369   : > { %v2273_v19 = vadd.f32 %v2595_v16, %v2272_v18 }
0x136a   : > { %v2891_v20 = vpop.f32.mrf.mxu1 }
0x136b   : > { %v2599_v21 = vmul.f32 -1.702, %v2273_v19 }
0x136c   : > { %v2275_v22 = vpop.f32.mrf.mxu1 }
0x136d   : > { %v2280_v23 = vmul.f32 1.442695, %v2599_v21 }
0x136e   : > { %v2892_v24 = vpop.f32.mrf.mxu1 }
0x136f   : > { %3051 = vpow2.f32 %v2280_v23 }
0x137c   : > { %v3052_v25 = vpop.eup %3051 }
0x137d   : > { %v2282_v26 = vadd.f32 1.0, %v3052_v25 }
0x137f   : > { %3053 = vrcp.f32 %v2282_v26 }
0x138c   : > { %v3054_v2 = vpop.eup %3053 }
0x138d   : > { %v2285_v27 = vmul.f32 %v3054_v2, %v2273_v19 }
0x138f   : > { %v2286_v29 = vpack.c.bf16 %v2285_v27, %v2285_v27 }
0x1391   : > { %2910 = vmatmul.mubr.bf16.vlgmr.msra.gmra.mxu0 %v2286_v29 }
0x1451   : > { %v2386_v30 = vpop.f32.mrf.mxu0 }
0x1452   : > { %v2392_v32 = vadd.f32 %v2386_v30, %v3647_v53 }
0x1453   : > { %v2911_v33 = vpop.f32.mrf.mxu0 }
0x1454   : > { %v2401_v34 = vadd.f32 %v2625_v31, %v2392_v32 }
0x1455   : > { %v2389_v35 = vpop.f32.mrf.mxu0 }
0x1456   : > { %v2404_v36 = vsel %vm666_vm3, %v2401_v34, 0.0 }
0x1457   : > { %2405 = vadd.xlane.f32.xlu0 %v2404_v36  ;;  %v2912_v37 = vpop.f32.mrf.mxu0 }
0x14e0   : > { %v2406_v38 = vpop.xlane.xlu0 %2405 }
0x14e1   : > { %v2407_v39 = vmul.f32 0.03125, %v2406_v38 }
0x14e3   : > { %v2408_v40 = vsub.f32 %v2401_v34, %v2407_v39 }
0x14e5   : > { %v2409_v42 = vmul.f32 %v2408_v40, %v2408_v40 }
0x14e7   : > { %v2410_v43 = vsel %vm666_vm3, %v2409_v42, 0.0 }
0x14e8   : > { %2411 = vadd.xlane.f32.xlu1 %v2410_v43 }
0x1571   : > { %v2412_v1 = vpop.xlane.xlu1 %2411 }
0x1572   : > { %v2413_v44 = vmul.f32 0.03125, %v2412_v1 }
0x1574   : > { %v2414_v45 = vadd.f32 1e-05, %v2413_v44 }
0x1576   : > { %3055 = vrsqrt.f32 %v2414_v45 }
0x1583   : > { %v3056_v46 = vpop.eup %3055 }
0x1584   : > { %v2416_v48 = vmul.f32 %v3056_v46, %v2408_v40 }
0x1586   : > { %v2423_v50 = vmul.f32 %v2626_v47, %v2416_v48 }
0x1588   : > { %v2430_v51 = vadd.f32 %v2627_v49, %v2423_v50 }
0x158a   : > { %2431 = vst.msk [vmem:[%s539_s21] sm:$0xff] %vm666_vm3, %v2430_v51 }
0x158b   : > { %3070 = shalt.err (!%p3067_p3)
}
0x158c   : > { %s3071_s2 = scalar_lea.hbm %s2444_s3, 128  ;;  %s3075_s26 = scalar_lea.hbm %s3765_s17, 256 }
0x158d   : > { %p3072_p4 = scmp.ne.s32.totalorder %s2444_s3, %s3071_s2  ;;  %p3076_p9 = scmp.lt.s32.totalorder %s2444_s3, %s3765_s17 }
0x158e   : > { %p3077_p10 = scmp.lt.s32.totalorder %s3075_s26, %s3071_s2 }
0x158f   : > { %p3073_p7 = pnand %p3072_p4, %p3266_p5 }
0x1590   : > { %p3078_p11 = por %p3077_p10, %p3076_p9 }
0x1591   : > { %p3074_p8 = pneg %p3073_p7 }
0x1593   : > { %p3079_p12 = pnand %p3078_p11, %p3074_p8 }
0x1595   : > { %3082 = shalt.err (!%p3079_p12)
}
0x1596   : > { %2913 = dma.vmem_to_hbm [thread:$0]  (%p3266_p5), %s2447_s29, 128, %s2444_s3, %s2433_s4  }
0x1597 PF: > { %s3811_s24 = sld [smem:[#allocation5_spill]]  ;;  %p2919_p13 = scmp.ge.s32.totalorder %s3117_s27, 2 }
0x1599   : > { %p2916_p0 = pnand %p2919_p13, %p3270_p6 }
0x159b   : > { %p2917_p1 = pneg %p2916_p0 }
0x159d   : > { %s2458_s22 = sand.u32 1, %s3811_s24  }
0x159e   : > { %s2459_s30 = scalar_lea.sflag [#allocation3], %s2458_s22 }
0x159f   : > { %3100 = dma.done.wait (%p2917_p1), %s2459_s30, 128  }
0x15a0   : > { %3102 = vsyncadd (%p2917_p1), %s2459_s30, 4294967168  ;;  %s3813_s27 = sld [smem:[#allocation7_spill]]  ;;  %s3816_s24 = smov %s3109_s25 }
0x15a1   : > { %s3814_s28 = sld [smem:[#allocation6_spill]] }
0x15a2   : > { %s3815_s26 = sld [smem:[#allocation8_spill]] }
0x15a6   : > { %p27_p2 = scmp.ge.s32.totalorder %s3813_s27, 4  }
0x15a7   : > { %s3817_s25 = smov %s3814_s28 }
0x15a8   :  { %29 = sbr.rel (!%p27_p2) target bundleno = 9 (0x9), region = 135 }
0x15ad   :  { %2464 = vsyncpa [#allocation3], 1 }
0x15ae   :  { %2466 = vsyncpa [#allocation3 + $0x1], 1 }

</bundles_post_ra>
